<compile_context>
chip_gen: v7x
topology: tpu7x:2x2x1
jax: 0.10.0
libtpu: 0.0.40
codegen_flags: <defaults>
</compile_context>

<pallas_src>
import functools

import jax
import jax.numpy as jnp
import numpy as np
from jax.experimental import pallas as pl
from jax.experimental.pallas import tpu as pltpu


def _round_up(x, m):
    return ((x + m - 1) // m) * m


# ---------------------------------------------------------------------------
# Pallas kernel
# ---------------------------------------------------------------------------
def roan_des_kernel(e_ref, r_ref, idx_ref, times_ref, prer_ref, o_ref,
                    *, alp, s_dim, t_dim):
    tb = idx_ref.shape[0]
    ne = e_ref.shape[0]          # padded entity vocab (multiple of 128)
    nr = r_ref.shape[0]          # padded relation vocab (multiple of 128)
    s2 = 2 * s_dim
    t2 = 2 * t_dim
    emb = s_dim + t_dim

    idx = idx_ref[...]                       # (TB, 3) int32: [head, rel, tail]
    heads = idx[:, 0:1]
    rels = idx[:, 1:2]
    tails = idx[:, 2:3]

    def onehot(col_idx, n):
        iota = jax.lax.broadcasted_iota(jnp.int32, (tb, n), 1)
        return jnp.where(col_idx == iota, 1.0, 0.0).astype(jnp.float32)

    # In-kernel gathers on the idle MXU (exact: single 1.0 per row).
    eh = jnp.dot(onehot(heads, ne), e_ref[...],
                 preferred_element_type=jnp.float32)   # (TB, 2s+18t) @ heads
    et = jnp.dot(onehot(tails, ne), e_ref[...],
                 preferred_element_type=jnp.float32)   # (TB, 2s+18t) @ tails
    rr = jnp.dot(onehot(rels, nr), r_ref[...],
                 preferred_element_type=jnp.float32)   # (TB, 2*emb)  @ rels

    # Sin time embeddings, packed [TE_h(x) | TE_t(x)] over 2*t_dim lanes.
    def te_pack(ex):
        acc = None
        for c in range(3):                   # y, m, d  (static unroll)
            base = s2 + 3 * t2 * c
            amps = ex[:, base:base + t2]
            freq = ex[:, base + t2:base + 2 * t2]
            phi = ex[:, base + 2 * t2:base + 3 * t2]
            t_c = times_ref[:, c:c + 1]      # (TB, 1) -> lane broadcast
            term = amps * jnp.sin(freq * t_c + phi)
            acc = term if acc is None else acc + term
        return acc

    teh = te_pack(eh)                        # [TE_h(head) | TE_t(head)]
    tet = te_pack(et)                        # [TE_h(tail) | TE_t(tail)]

    # Relation blend (r_tab layout: [rel_f | rel_i]).
    prer = prer_ref[...]                     # (TB, emb)
    r1 = (1.0 - alp) * rr[:, 0:emb] + alp * prer
    r2 = (1.0 - alp) * rr[:, emb:2 * emb] + alp * prer

    # static part: ent_h[head]*ent_t[tail]*r1_s + ent_h[tail]*ent_t[head]*r2_s
    s_part = (eh[:, 0:s_dim] * et[:, s_dim:s2] * r1[:, 0:s_dim]
              + et[:, 0:s_dim] * eh[:, s_dim:s2] * r2[:, 0:s_dim])
    # time part: TE_h(head)*TE_t(tail)*r1_t + TE_h(tail)*TE_t(head)*r2_t
    t_part = (teh[:, 0:t_dim] * tet[:, t_dim:t2] * r1[:, s_dim:emb]
              + tet[:, 0:t_dim] * teh[:, t_dim:t2] * r2[:, s_dim:emb])

    # TODO(synk): F.dropout omitted — module evaluated in eval mode (identity).
    o_ref[...] = 0.5 * (jnp.sum(s_part, axis=1, keepdims=True)
                        + jnp.sum(t_part, axis=1, keepdims=True))   # (TB, 1)


# ---------------------------------------------------------------------------
# Parameter construction (deterministic, in-script)
# ---------------------------------------------------------------------------
def make_params(key, num_ent, num_rel, s_dim, t_dim, emb_dim):
    names_static = ["ent_embs_h", "ent_embs_t"]
    names_rel = ["rel_embs_f", "rel_embs_i"]
    time_names = []
    for kind in ["freq", "phi", "amps"]:
        for p in ["y", "m", "d"]:
            for ht in ["h", "t"]:
                time_names.append(f"{p}_{kind}_{ht}")

    params = {}
    keys = jax.random.split(key, len(names_static) + len(names_rel) + len(time_names))
    ki = 0

    def xavier(k, shape):
        bound = float(np.sqrt(6.0 / (shape[0] + shape[1])))
        return jax.random.uniform(k, shape, jnp.float32, -bound, bound)

    for n in names_static:
        params[n] = xavier(keys[ki], (num_ent, s_dim)); ki += 1
    for n in names_rel:
        params[n] = xavier(keys[ki], (num_rel, emb_dim)); ki += 1
    for n in time_names:
        params[n] = xavier(keys[ki], (num_ent, t_dim)); ki += 1
    return params


# ---------------------------------------------------------------------------
# One-time table packing (batch independent — NOT per-forward HBM traffic)
# ---------------------------------------------------------------------------
def build_tables(params):
    num_ent, s_dim = params["ent_embs_h"].shape
    num_rel, emb_dim = params["rel_embs_f"].shape
    t_dim = params["y_freq_h"].shape[1]
    assert emb_dim == s_dim + t_dim

    cols = [params["ent_embs_h"], params["ent_embs_t"]]
    for comp in "ymd":
        for kind in ("amps", "freq", "phi"):
            cols.append(params[f"{comp}_{kind}_h"])
            cols.append(params[f"{comp}_{kind}_t"])
    e_tab = jnp.concatenate(cols, axis=1).astype(jnp.float32)      # (NE, 2s+18t)
    r_tab = jnp.concatenate([params["rel_embs_f"], params["rel_embs_i"]],
                            axis=1).astype(jnp.float32)            # (NR, 2*emb)

    ne_pad = _round_up(num_ent, 128)
    nr_pad = _round_up(num_rel, 128)
    e_tab = jnp.pad(e_tab, ((0, ne_pad - num_ent), (0, 0)))
    r_tab = jnp.pad(r_tab, ((0, nr_pad - num_rel), (0, 0)))
    return e_tab, r_tab, s_dim, t_dim


# ---------------------------------------------------------------------------
# Wrapper: small per-batch glue + pallas_call
# ---------------------------------------------------------------------------
def roan_des_forward(e_tab, r_tab, batch, pre_rel_emb, *, alp, s_dim, t_dim):
    heads, rels, tails, years, months, days = batch
    B = heads.shape[0]
    emb_dim = s_dim + t_dim

    idx = jnp.stack([heads, rels, tails], axis=1).astype(jnp.int32)       # (B, 3)
    times = jnp.stack([years, months, days], axis=1).astype(jnp.float32)  # (B, 3)
    prer = pre_rel_emb.astype(jnp.float32)                                # (B, emb)

    # >=2 grid steps (v7x 2-TC sharding); padding bounded to < one sublane
    # tile per step; TB capped around 1024 to keep intermediates small.
    n_steps = max(2, pl.cdiv(B, 1024))
    TB = _round_up(pl.cdiv(B, n_steps), 8)
    B_pad = TB * n_steps
    if B_pad != B:
        pad = B_pad - B
        idx = jnp.pad(idx, ((0, pad), (0, 0)))
        times = jnp.pad(times, ((0, pad), (0, 0)))
        prer = jnp.pad(prer, ((0, pad), (0, 0)))

    out = pl.pallas_call(
        functools.partial(roan_des_kernel, alp=float(alp),
                          s_dim=s_dim, t_dim=t_dim),
        out_shape=jax.ShapeDtypeStruct((B_pad, 1), jnp.float32),
        grid=(n_steps,),
        in_specs=[
            # tables: grid-invariant -> DMA'd once, resident in VMEM
            pl.BlockSpec(e_tab.shape, lambda i: (0, 0)),
            pl.BlockSpec(r_tab.shape, lambda i: (0, 0)),
            # per-sample streams
            pl.BlockSpec((TB, 3), lambda i: (i, 0)),
            pl.BlockSpec((TB, 3), lambda i: (i, 0)),
            pl.BlockSpec((TB, emb_dim), lambda i: (i, 0)),
        ],
        out_specs=pl.BlockSpec((TB, 1), lambda i: (i, 0)),
        compiler_params=pltpu.CompilerParams(
            dimension_semantics=("parallel",),
            vmem_limit_bytes=48 * 1024 * 1024),
    )(e_tab, r_tab, idx, times, prer)
    return out[:B, 0]    # (B,) like torch.sum(scores, dim=1)


# ---------------------------------------------------------------------------
# Pure-JAX reference (mirrors the PyTorch forward, eval mode)
# ---------------------------------------------------------------------------
def roan_des_reference(params, batch, pre_rel_emb, alp):
    heads, rels, tails, years, months, days = batch
    years = years[:, None].astype(jnp.float32)
    months = months[:, None].astype(jnp.float32)
    days = days[:, None].astype(jnp.float32)

    def time_emb(ents, ht):
        emb = params[f"y_amps_{ht}"][ents] * jnp.sin(
            params[f"y_freq_{ht}"][ents] * years + params[f"y_phi_{ht}"][ents])
        emb += params[f"m_amps_{ht}"][ents] * jnp.sin(
            params[f"m_freq_{ht}"][ents] * months + params[f"m_phi_{ht}"][ents])
        emb += params[f"d_amps_{ht}"][ents] * jnp.sin(
            params[f"d_freq_{ht}"][ents] * days + params[f"d_phi_{ht}"][ents])
        return emb

    h1 = jnp.concatenate([params["ent_embs_h"][heads], time_emb(heads, "h")], axis=1)
    t1 = jnp.concatenate([params["ent_embs_t"][tails], time_emb(tails, "t")], axis=1)
    h2 = jnp.concatenate([params["ent_embs_h"][tails], time_emb(tails, "h")], axis=1)
    t2 = jnp.concatenate([params["ent_embs_t"][heads], time_emb(heads, "t")], axis=1)
    r1 = (1.0 - alp) * params["rel_embs_f"][rels] + alp * pre_rel_emb
    r2 = (1.0 - alp) * params["rel_embs_i"][rels] + alp * pre_rel_emb
    scores = (h1 * r1 * t1 + h2 * r2 * t2) / 2.0
    return jnp.sum(scores, axis=1)


# ---------------------------------------------------------------------------
if __name__ == "__main__":
    NUM_ENT, NUM_REL = 20, 6
    S_DIM, T_DIM = 32, 32
    EMB_DIM = S_DIM + T_DIM
    ALP = 0.3
    B = 10   # not a multiple of the tile -> exercises padding/slicing + 2 grid steps

    root = jax.random.PRNGKey(0)
    kp, kh, kr, kt, ky, km, kd, kpre = jax.random.split(root, 8)

    params = make_params(kp, NUM_ENT, NUM_REL, S_DIM, T_DIM, EMB_DIM)
    e_tab, r_tab, s_dim, t_dim = build_tables(params)   # one-time packing

    heads = jax.random.randint(kh, (B,), 0, NUM_ENT)
    rels = jax.random.randint(kr, (B,), 0, NUM_REL)
    tails = jax.random.randint(kt, (B,), 0, NUM_ENT)
    years = jax.random.uniform(ky, (B,), jnp.float32)
    months = jax.random.uniform(km, (B,), jnp.float32)
    days = jax.random.uniform(kd, (B,), jnp.float32)
    batch = (heads, rels, tails, years, months, days)

    # TODO(synk): Rel_time_emb (self.Rel_emb) is an external, undefined module;
    # its output pre_rel_emb is modeled here as a deterministic (B, emb_dim) input.
    pre_rel_emb = jax.random.normal(kpre, (B, EMB_DIM), jnp.float32) * 0.1

    # TODO(synk): alp is baked in as a static Python float (inference-style);
    # pass it as an SMEM scalar if it ever becomes a traced/learned value.
    fwd = jax.jit(functools.partial(roan_des_forward,
                                    alp=ALP, s_dim=s_dim, t_dim=t_dim))
    out = jax.block_until_ready(fwd(e_tab, r_tab, batch, pre_rel_emb))

    ref = roan_des_reference(params, batch, pre_rel_emb, ALP)
    np.testing.assert_allclose(np.asarray(out), np.asarray(ref),
                               rtol=1e-5, atol=1e-4)

    print("KERNEL_OK")
</pallas_src>

<mosaic_0001>
module attributes {stable_mosaic.version = 11 : i64} {
  func.func @roan_des_kernel(%arg0: i32, %arg1: memref<128x640xf32, #tpu.memory_space<vmem>>, %arg2: memref<128x128xf32, #tpu.memory_space<vmem>>, %arg3: memref<8x3xi32, #tpu.memory_space<vmem>>, %arg4: memref<8x3xf32, #tpu.memory_space<vmem>>, %arg5: memref<8x64xf32, #tpu.memory_space<vmem>>, %arg6: memref<8x1xf32, #tpu.memory_space<vmem>>) attributes {dimension_semantics = [#tpu.dimension_semantics<parallel>], iteration_bounds = array<i64: 2>, scalar_prefetch = 0 : i64, scratch_operands = 0 : i64, tpu.core_type = #tpu.core_type<tc>, window_params = [{pipeline_mode = #tpu.pipeline_mode<synchronous>, transform_indices = @transform_0, window_bounds = array<i64: 128, 640>}, {pipeline_mode = #tpu.pipeline_mode<synchronous>, transform_indices = @transform_1, window_bounds = array<i64: 128, 128>}, {transform_indices = @transform_2, window_bounds = array<i64: 8, 3>}, {transform_indices = @transform_3, window_bounds = array<i64: 8, 3>}, {transform_indices = @transform_4, window_bounds = array<i64: 8, 64>}, {transform_indices = @transform_5, window_bounds = array<i64: 8, 1>}]} {
    %c0 = arith.constant 0 : index
    %c0_0 = arith.constant 0 : index
    %0 = vector.load %arg3[%c0, %c0_0] : memref<8x3xi32, #tpu.memory_space<vmem>>, vector<8x3xi32>
    %1 = vector.extract_strided_slice %0 {offsets = [0, 0], sizes = [8, 1], strides = [1, 1]} : vector<8x3xi32> to vector<8x1xi32>
    %2 = vector.extract_strided_slice %0 {offsets = [0, 1], sizes = [8, 1], strides = [1, 1]} : vector<8x3xi32> to vector<8x1xi32>
    %3 = vector.extract_strided_slice %0 {offsets = [0, 2], sizes = [8, 1], strides = [1, 1]} : vector<8x3xi32> to vector<8x1xi32>
    %4 = tpu.iota {dimensions = array<i32: 1>} : vector<8x128xi32>
    %5 = vector.broadcast %1 : vector<8x1xi32> to vector<8x128xi32>
    %6 = arith.cmpi eq, %5, %4 : vector<8x128xi32>
    %cst = arith.constant 1.000000e+00 : f32
    %cst_1 = arith.constant 0.000000e+00 : f32
    %7 = vector.broadcast %cst : f32 to vector<8x128xf32>
    %8 = vector.broadcast %cst_1 : f32 to vector<8x128xf32>
    %9 = arith.select %6, %7, %8 : vector<8x128xi1>, vector<8x128xf32>
    %c0_2 = arith.constant 0 : index
    %c0_3 = arith.constant 0 : index
    %10 = vector.load %arg1[%c0_2, %c0_3] : memref<128x640xf32, #tpu.memory_space<vmem>>, vector<128x640xf32>
    %cst_4 = arith.constant dense<0.000000e+00> : vector<8x640xf32>
    %11 = tpu.matmul %9, %10, %cst_4 {dimension_numbers = #tpu.dot_dimension_numbers<[1], [0], [0], [1], [0, 0, 1, 1], [], []>} : vector<8x128xf32>, vector<128x640xf32>, vector<8x640xf32> -> vector<8x640xf32>
    %12 = tpu.iota {dimensions = array<i32: 1>} : vector<8x128xi32>
    %13 = vector.broadcast %3 : vector<8x1xi32> to vector<8x128xi32>
    %14 = arith.cmpi eq, %13, %12 : vector<8x128xi32>
    %cst_5 = arith.constant 1.000000e+00 : f32
    %cst_6 = arith.constant 0.000000e+00 : f32
    %15 = vector.broadcast %cst_5 : f32 to vector<8x128xf32>
    %16 = vector.broadcast %cst_6 : f32 to vector<8x128xf32>
    %17 = arith.select %14, %15, %16 : vector<8x128xi1>, vector<8x128xf32>
    %c0_7 = arith.constant 0 : index
    %c0_8 = arith.constant 0 : index
    %18 = vector.load %arg1[%c0_7, %c0_8] : memref<128x640xf32, #tpu.memory_space<vmem>>, vector<128x640xf32>
    %cst_9 = arith.constant dense<0.000000e+00> : vector<8x640xf32>
    %19 = tpu.matmul %17, %18, %cst_9 {dimension_numbers = #tpu.dot_dimension_numbers<[1], [0], [0], [1], [0, 0, 1, 1], [], []>} : vector<8x128xf32>, vector<128x640xf32>, vector<8x640xf32> -> vector<8x640xf32>
    %20 = tpu.iota {dimensions = array<i32: 1>} : vector<8x128xi32>
    %21 = vector.broadcast %2 : vector<8x1xi32> to vector<8x128xi32>
    %22 = arith.cmpi eq, %21, %20 : vector<8x128xi32>
    %cst_10 = arith.constant 1.000000e+00 : f32
    %cst_11 = arith.constant 0.000000e+00 : f32
    %23 = vector.broadcast %cst_10 : f32 to vector<8x128xf32>
    %24 = vector.broadcast %cst_11 : f32 to vector<8x128xf32>
    %25 = arith.select %22, %23, %24 : vector<8x128xi1>, vector<8x128xf32>
    %c0_12 = arith.constant 0 : index
    %c0_13 = arith.constant 0 : index
    %26 = vector.load %arg2[%c0_12, %c0_13] : memref<128x128xf32, #tpu.memory_space<vmem>>, vector<128x128xf32>
    %cst_14 = arith.constant dense<0.000000e+00> : vector<8x128xf32>
    %27 = tpu.matmul %25, %26, %cst_14 {dimension_numbers = #tpu.dot_dimension_numbers<[1], [0], [0], [1], [0, 0, 1, 1], [], []>} : vector<8x128xf32>, vector<128x128xf32>, vector<8x128xf32> -> vector<8x128xf32>
    %28 = vector.extract_strided_slice %11 {offsets = [0, 64], sizes = [8, 64], strides = [1, 1]} : vector<8x640xf32> to vector<8x64xf32>
    %29 = vector.extract_strided_slice %11 {offsets = [0, 128], sizes = [8, 64], strides = [1, 1]} : vector<8x640xf32> to vector<8x64xf32>
    %30 = vector.extract_strided_slice %11 {offsets = [0, 192], sizes = [8, 64], strides = [1, 1]} : vector<8x640xf32> to vector<8x64xf32>
    %c0_15 = arith.constant 0 : index
    %c0_16 = arith.constant 0 : index
    %31 = vector.load %arg4[%c0_15, %c0_16] : memref<8x3xf32, #tpu.memory_space<vmem>>, vector<8x1xf32>
    %32 = vector.broadcast %31 : vector<8x1xf32> to vector<8x64xf32>
    %33 = arith.mulf %29, %32 : vector<8x64xf32>
    %34 = arith.addf %33, %30 : vector<8x64xf32>
    %35 = math.sin %34 : vector<8x64xf32>
    %36 = arith.mulf %28, %35 : vector<8x64xf32>
    %37 = vector.extract_strided_slice %11 {offsets = [0, 256], sizes = [8, 64], strides = [1, 1]} : vector<8x640xf32> to vector<8x64xf32>
    %38 = vector.extract_strided_slice %11 {offsets = [0, 320], sizes = [8, 64], strides = [1, 1]} : vector<8x640xf32> to vector<8x64xf32>
    %39 = vector.extract_strided_slice %11 {offsets = [0, 384], sizes = [8, 64], strides = [1, 1]} : vector<8x640xf32> to vector<8x64xf32>
    %c0_17 = arith.constant 0 : index
    %c1 = arith.constant 1 : index
    %40 = vector.load %arg4[%c0_17, %c1] : memref<8x3xf32, #tpu.memory_space<vmem>>, vector<8x1xf32>
    %41 = vector.broadcast %40 : vector<8x1xf32> to vector<8x64xf32>
    %42 = arith.mulf %38, %41 : vector<8x64xf32>
    %43 = arith.addf %42, %39 : vector<8x64xf32>
    %44 = math.sin %43 : vector<8x64xf32>
    %45 = arith.mulf %37, %44 : vector<8x64xf32>
    %46 = arith.addf %36, %45 : vector<8x64xf32>
    %47 = vector.extract_strided_slice %11 {offsets = [0, 448], sizes = [8, 64], strides = [1, 1]} : vector<8x640xf32> to vector<8x64xf32>
    %48 = vector.extract_strided_slice %11 {offsets = [0, 512], sizes = [8, 64], strides = [1, 1]} : vector<8x640xf32> to vector<8x64xf32>
    %49 = vector.extract_strided_slice %11 {offsets = [0, 576], sizes = [8, 64], strides = [1, 1]} : vector<8x640xf32> to vector<8x64xf32>
    %c0_18 = arith.constant 0 : index
    %c2 = arith.constant 2 : index
    %50 = vector.load %arg4[%c0_18, %c2] : memref<8x3xf32, #tpu.memory_space<vmem>>, vector<8x1xf32>
    %51 = vector.broadcast %50 : vector<8x1xf32> to vector<8x64xf32>
    %52 = arith.mulf %48, %51 : vector<8x64xf32>
    %53 = arith.addf %52, %49 : vector<8x64xf32>
    %54 = math.sin %53 : vector<8x64xf32>
    %55 = arith.mulf %47, %54 : vector<8x64xf32>
    %56 = arith.addf %46, %55 : vector<8x64xf32>
    %57 = vector.extract_strided_slice %19 {offsets = [0, 64], sizes = [8, 64], strides = [1, 1]} : vector<8x640xf32> to vector<8x64xf32>
    %58 = vector.extract_strided_slice %19 {offsets = [0, 128], sizes = [8, 64], strides = [1, 1]} : vector<8x640xf32> to vector<8x64xf32>
    %59 = vector.extract_strided_slice %19 {offsets = [0, 192], sizes = [8, 64], strides = [1, 1]} : vector<8x640xf32> to vector<8x64xf32>
    %c0_19 = arith.constant 0 : index
    %c0_20 = arith.constant 0 : index
    %60 = vector.load %arg4[%c0_19, %c0_20] : memref<8x3xf32, #tpu.memory_space<vmem>>, vector<8x1xf32>
    %61 = vector.broadcast %60 : vector<8x1xf32> to vector<8x64xf32>
    %62 = arith.mulf %58, %61 : vector<8x64xf32>
    %63 = arith.addf %62, %59 : vector<8x64xf32>
    %64 = math.sin %63 : vector<8x64xf32>
    %65 = arith.mulf %57, %64 : vector<8x64xf32>
    %66 = vector.extract_strided_slice %19 {offsets = [0, 256], sizes = [8, 64], strides = [1, 1]} : vector<8x640xf32> to vector<8x64xf32>
    %67 = vector.extract_strided_slice %19 {offsets = [0, 320], sizes = [8, 64], strides = [1, 1]} : vector<8x640xf32> to vector<8x64xf32>
    %68 = vector.extract_strided_slice %19 {offsets = [0, 384], sizes = [8, 64], strides = [1, 1]} : vector<8x640xf32> to vector<8x64xf32>
    %c0_21 = arith.constant 0 : index
    %c1_22 = arith.constant 1 : index
    %69 = vector.load %arg4[%c0_21, %c1_22] : memref<8x3xf32, #tpu.memory_space<vmem>>, vector<8x1xf32>
    %70 = vector.broadcast %69 : vector<8x1xf32> to vector<8x64xf32>
    %71 = arith.mulf %67, %70 : vector<8x64xf32>
    %72 = arith.addf %71, %68 : vector<8x64xf32>
    %73 = math.sin %72 : vector<8x64xf32>
    %74 = arith.mulf %66, %73 : vector<8x64xf32>
    %75 = arith.addf %65, %74 : vector<8x64xf32>
    %76 = vector.extract_strided_slice %19 {offsets = [0, 448], sizes = [8, 64], strides = [1, 1]} : vector<8x640xf32> to vector<8x64xf32>
    %77 = vector.extract_strided_slice %19 {offsets = [0, 512], sizes = [8, 64], strides = [1, 1]} : vector<8x640xf32> to vector<8x64xf32>
    %78 = vector.extract_strided_slice %19 {offsets = [0, 576], sizes = [8, 64], strides = [1, 1]} : vector<8x640xf32> to vector<8x64xf32>
    %c0_23 = arith.constant 0 : index
    %c2_24 = arith.constant 2 : index
    %79 = vector.load %arg4[%c0_23, %c2_24] : memref<8x3xf32, #tpu.memory_space<vmem>>, vector<8x1xf32>
    %80 = vector.broadcast %79 : vector<8x1xf32> to vector<8x64xf32>
    %81 = arith.mulf %77, %80 : vector<8x64xf32>
    %82 = arith.addf %81, %78 : vector<8x64xf32>
    %83 = math.sin %82 : vector<8x64xf32>
    %84 = arith.mulf %76, %83 : vector<8x64xf32>
    %85 = arith.addf %75, %84 : vector<8x64xf32>
    %c0_25 = arith.constant 0 : index
    %c0_26 = arith.constant 0 : index
    %86 = vector.load %arg5[%c0_25, %c0_26] : memref<8x64xf32, #tpu.memory_space<vmem>>, vector<8x64xf32>
    %87 = vector.extract_strided_slice %27 {offsets = [0, 0], sizes = [8, 64], strides = [1, 1]} : vector<8x128xf32> to vector<8x64xf32>
    %cst_27 = arith.constant 0.699999988 : f32
    %88 = vector.broadcast %cst_27 : f32 to vector<8x64xf32>
    %89 = arith.mulf %88, %87 : vector<8x64xf32>
    %cst_28 = arith.constant 3.000000e-01 : f32
    %90 = vector.broadcast %cst_28 : f32 to vector<8x64xf32>
    %91 = arith.mulf %90, %86 : vector<8x64xf32>
    %92 = arith.addf %89, %91 : vector<8x64xf32>
    %93 = vector.extract_strided_slice %27 {offsets = [0, 64], sizes = [8, 64], strides = [1, 1]} : vector<8x128xf32> to vector<8x64xf32>
    %cst_29 = arith.constant 0.699999988 : f32
    %94 = vector.broadcast %cst_29 : f32 to vector<8x64xf32>
    %95 = arith.mulf %94, %93 : vector<8x64xf32>
    %cst_30 = arith.constant 3.000000e-01 : f32
    %96 = vector.broadcast %cst_30 : f32 to vector<8x64xf32>
    %97 = arith.mulf %96, %86 : vector<8x64xf32>
    %98 = arith.addf %95, %97 : vector<8x64xf32>
    %99 = vector.extract_strided_slice %11 {offsets = [0, 0], sizes = [8, 32], strides = [1, 1]} : vector<8x640xf32> to vector<8x32xf32>
    %100 = vector.extract_strided_slice %19 {offsets = [0, 32], sizes = [8, 32], strides = [1, 1]} : vector<8x640xf32> to vector<8x32xf32>
    %101 = arith.mulf %99, %100 : vector<8x32xf32>
    %102 = vector.extract_strided_slice %92 {offsets = [0, 0], sizes = [8, 32], strides = [1, 1]} : vector<8x64xf32> to vector<8x32xf32>
    %103 = arith.mulf %101, %102 : vector<8x32xf32>
    %104 = vector.extract_strided_slice %19 {offsets = [0, 0], sizes = [8, 32], strides = [1, 1]} : vector<8x640xf32> to vector<8x32xf32>
    %105 = vector.extract_strided_slice %11 {offsets = [0, 32], sizes = [8, 32], strides = [1, 1]} : vector<8x640xf32> to vector<8x32xf32>
    %106 = arith.mulf %104, %105 : vector<8x32xf32>
    %107 = vector.extract_strided_slice %98 {offsets = [0, 0], sizes = [8, 32], strides = [1, 1]} : vector<8x64xf32> to vector<8x32xf32>
    %108 = arith.mulf %106, %107 : vector<8x32xf32>
    %109 = arith.addf %103, %108 : vector<8x32xf32>
    %110 = vector.extract_strided_slice %56 {offsets = [0, 0], sizes = [8, 32], strides = [1, 1]} : vector<8x64xf32> to vector<8x32xf32>
    %111 = vector.extract_strided_slice %85 {offsets = [0, 32], sizes = [8, 32], strides = [1, 1]} : vector<8x64xf32> to vector<8x32xf32>
    %112 = arith.mulf %110, %111 : vector<8x32xf32>
    %113 = vector.extract_strided_slice %92 {offsets = [0, 32], sizes = [8, 32], strides = [1, 1]} : vector<8x64xf32> to vector<8x32xf32>
    %114 = arith.mulf %112, %113 : vector<8x32xf32>
    %115 = vector.extract_strided_slice %85 {offsets = [0, 0], sizes = [8, 32], strides = [1, 1]} : vector<8x64xf32> to vector<8x32xf32>
    %116 = vector.extract_strided_slice %56 {offsets = [0, 32], sizes = [8, 32], strides = [1, 1]} : vector<8x64xf32> to vector<8x32xf32>
    %117 = arith.mulf %115, %116 : vector<8x32xf32>
    %118 = vector.extract_strided_slice %98 {offsets = [0, 32], sizes = [8, 32], strides = [1, 1]} : vector<8x64xf32> to vector<8x32xf32>
    %119 = arith.mulf %117, %118 : vector<8x32xf32>
    %120 = arith.addf %114, %119 : vector<8x32xf32>
    %cst_31 = arith.constant dense<0.000000e+00> : vector<8xf32>
    %121 = vector.multi_reduction <add>, %109, %cst_31 [1] : vector<8x32xf32> to vector<8xf32>
    %122 = vector.shape_cast %121 : vector<8xf32> to vector<8x1xf32>
    %cst_32 = arith.constant dense<0.000000e+00> : vector<8xf32>
    %123 = vector.multi_reduction <add>, %120, %cst_32 [1] : vector<8x32xf32> to vector<8xf32>
    %124 = vector.shape_cast %123 : vector<8xf32> to vector<8x1xf32>
    %125 = arith.addf %122, %124 : vector<8x1xf32>
    %cst_33 = arith.constant 5.000000e-01 : f32
    %126 = vector.broadcast %cst_33 : f32 to vector<8x1xf32>
    %127 = arith.mulf %126, %125 : vector<8x1xf32>
    %c0_34 = arith.constant 0 : index
    %c0_35 = arith.constant 0 : index
    %128 = vector.load %arg6[%c0_34, %c0_35] : memref<8x1xf32, #tpu.memory_space<vmem>>, vector<8x1xf32>
    tpu.vector_store %arg6[%c0_34, %c0_35], %127 {strides = array<i32>} : memref<8x1xf32, #tpu.memory_space<vmem>>, vector<8x1xf32>,
    return
  }
  func.func @transform_0(%arg0: i32) -> (i32, i32) {
    %c0_i32 = arith.constant 0 : i32
    %c0_i32_0 = arith.constant 0 : i32
    %c0_i32_1 = arith.constant 0 : i32
    return %c0_i32, %c0_i32_0 : i32, i32
  }
  func.func @transform_1(%arg0: i32) -> (i32, i32) {
    %c0_i32 = arith.constant 0 : i32
    %c0_i32_0 = arith.constant 0 : i32
    %c0_i32_1 = arith.constant 0 : i32
    return %c0_i32, %c0_i32_0 : i32, i32
  }
  func.func @transform_2(%arg0: i32) -> (i32, i32) {
    %c0_i32 = arith.constant 0 : i32
    %c0_i32_0 = arith.constant 0 : i32
    return %arg0, %c0_i32 : i32, i32
  }
  func.func @transform_3(%arg0: i32) -> (i32, i32) {
    %c0_i32 = arith.constant 0 : i32
    %c0_i32_0 = arith.constant 0 : i32
    return %arg0, %c0_i32 : i32, i32
  }
  func.func @transform_4(%arg0: i32) -> (i32, i32) {
    %c0_i32 = arith.constant 0 : i32
    %c0_i32_0 = arith.constant 0 : i32
    return %arg0, %c0_i32 : i32, i32
  }
  func.func @transform_5(%arg0: i32) -> (i32, i32) {
    %c0_i32 = arith.constant 0 : i32
    %c0_i32_0 = arith.constant 0 : i32
    return %arg0, %c0_i32 : i32, i32
  }
}

</mosaic_0001>

<bundles_post_ra>
// kernel: roan_des_forward.1
= control target key start
LH: loop header
LB: loop body
LE: loop exit
PB: predicated region body
PF: predicated region fallthrough
CT: control target
= control target key end

     0   :  { %10 = vsyncpa [#allocation3], 0  ;;  %s2321_s18 = smov 0   ;;  %s3129_s0 = inlined_call_operand.hbm [shape: f32[128,640], index: 0, kind: input, shape index: {}]   ;;  %s3130_s1 = inlined_call_operand.vmem [shape: f32[128,128], index: 1, kind: input, shape index: {}]   ;;  %s3131_s2 = inlined_call_operand.vmem [shape: s32[16,3], index: 2, kind: input, shape index: {}]   ;;  %s3132_s3 = inlined_call_operand.vmem [shape: f32[16,3], index: 3, kind: input, shape index: {}]   ;;  %s3133_s4 = inlined_call_operand.vmem [shape: f32[16,64], index: 4, kind: input, shape index: {}]   ;;  %s3134_s5 = inlined_call_operand.vmem [shape: f32[16,1], index: 5, kind: output, shape index: {}]  }
   0x1 LB: > { %s2327_s19 = sadd.s32 4294967295, %s2270_s18   ;;  %p1745_p0 = scmp.ge.s32.totalorder %s2270_s18, 1  ;;  %s2270_s18 = sphi %s2321_s18, %s16_s18  }
   0x2   : > { %p167_p1 = scmp.lt.s32.totalorder %s2270_s18, 3  ;;  %s2272_s20 = smov [#allocation2]  }
   0x3   : > { %s179_s21 = sshll.u32 %s2272_s20, 4  ;;  %p3135_p3 = scmp.eq.s32.totalorder %s2327_s19, 0  ;;  %s180_s21 = int_to_ptr.vmem [resolvable:$true] %s179_s21 }
   0x4   : > { %p2331_p2 = pnand %p1745_p0, %p167_p1  ;;  %s2232_s26 = scalar_lea.hbm %s3129_s0, 10240 }
   0x5   : > { %p2233_p6 = scmp.ne.s32.totalorder %s3129_s0, %s2232_s26  ;;  %p2239_p10 = scmp.lt.u32.totalorder %s2232_s26, %s3129_s0 }
   0x6   : > { %s3137_s22 = scalar_select %p2331_p2, 1, 0 }
   0x7   : > { %p2171_p4 = pneg %p2331_p2 }
   0x9   : > { %p2340_p5 = pnand %p3135_p3, %p2171_p4 }
   0xb   : > { %p2234_p7 = pneg %p2340_p5 }
   0xd   : > { %p2235_p8 = pnand %p2234_p7, %p2233_p6 }
   0xf   : > { %p2236_p9 = pneg %p2235_p8 }
  0x11   : > { %p2241_p11 = pnand %p2239_p10, %p2236_p9 }
  0x13   : > { %2244 = shalt.err (!%p2241_p11)
}
  0x14   : > { %s2245_s6 = scalar_lea.vmem %s180_s21, 10240  ;;  %p2253_p1 = scmp.lt.s32.totalorder %s180_s21, %s180_s21 }
  0x15   : > { %p2246_p12 = scmp.ne.s32.totalorder %s180_s21, %s2245_s6  ;;  %p2254_p4 = scmp.lt.s32.totalorder %s2245_s6, %s2245_s6 }
  0x17   : > { %p2248_p13 = pnand %p2246_p12, %p2234_p7  ;;  %p2255_p3 = por %p2254_p4, %p2253_p1 }
  0x19   : > { %p2249_p0 = pneg %p2248_p13 }
  0x1b   : > { %p2256_p2 = pnand %p2255_p3, %p2249_p0 }
  0x1d   : > { %2259 = shalt.err (!%p2256_p2)
}
  0x1e   : > { %s2273_s7 = smov 640   ;;  %s2274_s8 = smov 40  }
  0x1f   : > { %2174 = dma.hbm_to_vmem [thread:$0]  (!%p2340_p5), %s3129_s0, 10240, %s180_s21, [#allocation3], %s2273_s7, %s2273_s7, %s2274_s8  }
  0x20   : > { %p3139_p6 = scmp.ne.s32.totalorder %s3137_s22, 0 }
  0x21   : > { %p3140_p8 = scmp.eq.s32.totalorder (!%p3139_p6), %s2327_s19, 0 }
  0x22   : > { %219 = sbr.rel (%p3139_p6) target bundleno = 1276 (0x4fc), region = 40 }
  0x29   : > { %2265 = dma.done.wait (%p3140_p8), [#allocation3], 10240   ;;  %p3141_p7 = pmov %p3140_p8 }
  0x2a   : > { %p253_p2 = scmp.lt.s32.totalorder %s2327_s19, 1  ;;  %v2275_v0 = vmov 0   ;;  %v278_v2 = vld [vmem:[#allocation2 + $0x8] sm:$0xff]  ;;  %v283_v3 = vld [vmem:[#allocation2 + $0x30] sm:$0xff]  ;;  %v280_v5 = vld [vmem:[#allocation2 + $0x18] sm:$0xff]  ;;  %v2276_v8 = vmov 0.0  }
  0x2b   : > { %2267 = vsyncadd (%p3141_p7), [#allocation3], 4294957056  ;;  %2204 = vset.pattern.permute.xlu0 %v2275_v0  ;;  %v2378_v4 = vpack.c.bf16 %v283_v3, %v278_v2  ;;  %v285_v6 = vld [vmem:[#allocation2 + $0x40] sm:$0xff]  ;;  %421 = vmatprep.mubr.f32.mxu0 %v2276_v8  ;;  %v282_v10 = vld [vmem:[#allocation2 + $0x28] sm:$0xff]  ;;  %v2277_v22 = vmov 2   ;;  %vm2281_vm1 = vmmov 0  }
  0x2c   : > { %s3151_s19 = smov (!%p253_p2, %s2327_s19), 1  ;;  %v277_v7 = vld [vmem:[#allocation2] sm:$0xff]  ;;  %v2381_v9 = vpack.c.bf16 %v285_v6, %v280_v5  ;;  %v279_v11 = vld [vmem:[#allocation2 + $0x10] sm:$0xff]  ;;  %v284_v12 = vld [vmem:[#allocation2 + $0x38] sm:$0xff]  ;;  %492 = vmatprep.mubr.f32.mxu1 %v2276_v8  ;;  %s2289_s8 = smov 96  }
  0x2d   : > { %s2369_s11 = sshll.u32 %s3151_s19, 3  ;;  %1944 = vmatprep.subr.bf16.mxu0 %v2378_v4  ;;  %v2385_v13 = vpack.c.bf16 %v282_v10, %v277_v7  ;;  %v2387_v14 = vpack.c.bf16 %v284_v12, %v279_v11  ;;  %v288_v15 = vld [vmem:[#allocation2 + $0x58] sm:$0xff]  ;;  %v293_v16 = vld [vmem:[#allocation2 + $0x80] sm:$0xff]  ;;  %v290_v17 = vld [vmem:[#allocation2 + $0x68] sm:$0xff]  ;;  %s2282_s19 = smov 64  }
  0x2e   : > { %s256_s14 = scalar_lea.vmem %s3131_s2, %s2369_s11  ;;  %1976 = vmatprep.subr.bf16.mxu1 %v2381_v9  ;;  %v2390_v18 = vpack.c.bf16 %v293_v16, %v288_v15  ;;  %v295_v19 = vld [vmem:[#allocation2 + $0x90] sm:$0xff]  ;;  %v292_v21 = vld [vmem:[#allocation2 + $0x78] sm:$0xff]  ;;  %v289_v25 = vld [vmem:[#allocation2 + $0x60] sm:$0xff]  ;;  %s260_s17 = scalar_lea.vmem %s3132_s3, %s2369_s11 }
  0x2f   : > { %v2375_v1 = vld [vmem:[%s256_s14] sm:$0xff]  ;;  %v287_v20 = vld [vmem:[#allocation2 + $0x50] sm:$0xff]  ;;  %1946 = vmatpush1.bf16.msra.mxu0 %v2385_v13  ;;  %v2393_v23 = vpack.c.bf16 %v295_v19, %v290_v17  ;;  %v294_v26 = vld [vmem:[#allocation2 + $0x88] sm:$0xff]  ;;  %1978 = vmatpush1.bf16.msra.mxu1 %v2387_v14  ;;  %s264_s7 = scalar_lea.vmem %s3133_s4, %s2369_s11  ;;  %s2290_s9 = smov 32  }
  0x30   : > { %273 = vperm.xlu0 %2204, %v2375_v1   ;;  %v2395_v24 = vpack.c.bf16 %v292_v21, %v287_v20  ;;  %v298_v27 = vld [vmem:[#allocation2 + $0xa8] sm:$0xff]  ;;  %v2399_v28 = vpack.c.bf16 %v294_v26, %v289_v25  ;;  %v303_v29 = vld [vmem:[#allocation2 + $0xd0] sm:$0xff]  ;;  %v300_v30 = vld [vmem:[#allocation2 + $0xb8] sm:$0xff]  ;;  %1948 = vmatprep.subr.bf16.mxu0 %v2390_v18  ;;  %s268_s13 = scalar_lea.vmem %s3134_s5, %s2369_s11 }
  0x31   : > { %v305_v31 = vld [vmem:[#allocation2 + $0xe0] sm:$0xff]  ;;  %1980 = vmatprep.subr.bf16.mxu1 %v2393_v23  ;;  %v2403_v32 = vpack.c.bf16 %v303_v29, %v298_v27  ;;  %v302_v35 = vld [vmem:[#allocation2 + $0xc8] sm:$0xff]  ;;  %v299_v36 = vld [vmem:[#allocation2 + $0xb0] sm:$0xff] }
  0x32   : > { %v2405_v33 = vpack.c.bf16 %v305_v31, %v300_v30  ;;  %v297_v34 = vld [vmem:[#allocation2 + $0xa0] sm:$0xff]  ;;  %v304_v37 = vld [vmem:[#allocation2 + $0xd8] sm:$0xff]  ;;  %v310_v41 = vld [vmem:[#allocation2 + $0x108] sm:$0xff] }
  0x33   : > { %v308_v38 = vld [vmem:[#allocation2 + $0xf8] sm:$0xff]  ;;  %v313_v39 = vld [vmem:[#allocation2 + $0x120] sm:$0xff]  ;;  %1950 = vmatpush1.bf16.msra.mxu0 %v2395_v24  ;;  %v2408_v40 = vpack.c.bf16 %v302_v35, %v297_v34  ;;  %v315_v42 = vld [vmem:[#allocation2 + $0x130] sm:$0xff]  ;;  %1982 = vmatpush1.bf16.msra.mxu1 %v2399_v28  ;;  %v2412_v43 = vpack.c.bf16 %v304_v37, %v299_v36 }
  0x34   : > { %2205 = vset.pattern.permute.xlu0 %v2277_v22  ;;  %1952 = vmatprep.subr.bf16.mxu0 %v2403_v32  ;;  %v2414_v44 = vpack.c.bf16 %v313_v39, %v308_v38  ;;  %v307_v45 = vld [vmem:[#allocation2 + $0xf0] sm:$0xff]  ;;  %v312_v46 = vld [vmem:[#allocation2 + $0x118] sm:$0xff]  ;;  %v309_v47 = vld [vmem:[#allocation2 + $0x100] sm:$0xff]  ;;  %v2417_v48 = vpack.c.bf16 %v315_v42, %v310_v41 }
  0x35   : > { %570 = vperm.xlu0 %2205, %v2375_v1   ;;  %1984 = vmatprep.subr.bf16.mxu1 %v2405_v33  ;;  %v314_v49 = vld [vmem:[#allocation2 + $0x128] sm:$0xff]  ;;  %v323_v51 = vld [vmem:[#allocation2 + $0x170] sm:$0xff]  ;;  %v320_v52 = vld [vmem:[#allocation2 + $0x158] sm:$0xff]  ;;  %v2420_v54 = vpack.c.bf16 %v312_v46, %v307_v45 }
  0x36   : > { %v318_v50 = vld [vmem:[#allocation2 + $0x148] sm:$0xff]  ;;  %v325_v53 = vld [vmem:[#allocation2 + $0x180] sm:$0xff]  ;;  %v2424_v55 = vpack.c.bf16 %v314_v49, %v309_v47  ;;  %v319_v59 = vld [vmem:[#allocation2 + $0x150] sm:$0xff] }
  0x37   : > { %1954 = vmatpush1.bf16.msra.mxu0 %v2408_v40  ;;  %1986 = vmatpush1.bf16.msra.mxu1 %v2412_v43  ;;  %v2426_v56 = vpack.c.bf16 %v323_v51, %v318_v50  ;;  %v317_v57 = vld [vmem:[#allocation2 + $0x140] sm:$0xff]  ;;  %v322_v58 = vld [vmem:[#allocation2 + $0x168] sm:$0xff]  ;;  %v2429_v60 = vpack.c.bf16 %v325_v53, %v320_v52  ;;  %v324_v61 = vld [vmem:[#allocation2 + $0x178] sm:$0xff]  ;;  %v2278_v53 = vmov 0.0|0.0  }
  0x38   : > { %1956 = vmatprep.subr.bf16.mxu0 %v2414_v44  ;;  %1988 = vmatprep.subr.bf16.mxu1 %v2417_v48  ;;  %v328_v62 = vld [vmem:[#allocation2 + $0x198] sm:$0xff]  ;;  %v333_v63 = vld [vmem:[#allocation2 + $0x1c0] sm:$0xff]  ;;  %v330_v2 = vld [vmem:[#allocation2 + $0x1a8] sm:$0xff]  ;;  %v2432_v5 = vpack.c.bf16 %v322_v58, %v317_v57  ;;  %v2436_v6 = vpack.c.bf16 %v324_v61, %v319_v59  ;;  %v2279_v57 = vmov 1   ;;  %v270_v59 = vlaneseq }
  0x39   : > { %v335_v3 = vld [vmem:[#allocation2 + $0x1d0] sm:$0xff]  ;;  %v2438_v7 = vpack.c.bf16 %v333_v63, %v328_v62  ;;  %v332_v11 = vld [vmem:[#allocation2 + $0x1b8] sm:$0xff]  ;;  %v329_v12 = vld [vmem:[#allocation2 + $0x1a0] sm:$0xff]  ;;  %2206 = vset.pattern.permute.xlu1 %v2279_v57 }
  0x3a   : > { %v327_v10 = vld [vmem:[#allocation2 + $0x190] sm:$0xff]  ;;  %v2441_v15 = vpack.c.bf16 %v335_v3, %v330_v2  ;;  %v334_v16 = vld [vmem:[#allocation2 + $0x1c8] sm:$0xff]  ;;  %v340_v20 = vld [vmem:[#allocation2 + $0x1f8] sm:$0xff]  ;;  %787 = vperm.xlu1 %2206, %v2375_v1   ;;  %v2488_v63 = vand.u32 127, %v270_v59  ;;  %v2280_v1 = vmov 1.0  }
  0x3b   : > { %1958 = vmatpush1.bf16.msra.mxu0 %v2420_v54  ;;  %1990 = vmatpush1.bf16.msra.mxu1 %v2424_v55  ;;  %v338_v17 = vld [vmem:[#allocation2 + $0x1e8] sm:$0xff]  ;;  %v343_v19 = vld [vmem:[#allocation2 + $0x210] sm:$0xff]  ;;  %v345_v21 = vld [vmem:[#allocation2 + $0x220] sm:$0xff]  ;;  %v2444_v22 = vpack.c.bf16 %v332_v11, %v327_v10  ;;  %v2448_v25 = vpack.c.bf16 %v334_v16, %v329_v12 }
  0x3c   : > { %1960 = vmatprep.subr.bf16.mxu0 %v2426_v56  ;;  %1992 = vmatprep.subr.bf16.mxu1 %v2429_v60  ;;  %v2450_v26 = vpack.c.bf16 %v343_v19, %v338_v17  ;;  %v337_v27 = vld [vmem:[#allocation2 + $0x1e0] sm:$0xff]  ;;  %v342_v29 = vld [vmem:[#allocation2 + $0x208] sm:$0xff]  ;;  %v339_v30 = vld [vmem:[#allocation2 + $0x1f0] sm:$0xff]  ;;  %v2453_v31 = vpack.c.bf16 %v345_v21, %v340_v20 }
  0x3d   : > { %v344_v34 = vld [vmem:[#allocation2 + $0x218] sm:$0xff]  ;;  %v353_v36 = vld [vmem:[#allocation2 + $0x260] sm:$0xff]  ;;  %v350_v37 = vld [vmem:[#allocation2 + $0x248] sm:$0xff]  ;;  %v2456_v39 = vpack.c.bf16 %v342_v29, %v337_v27 }
  0x3e   : > { %v348_v35 = vld [vmem:[#allocation2 + $0x238] sm:$0xff]  ;;  %v355_v38 = vld [vmem:[#allocation2 + $0x270] sm:$0xff]  ;;  %v2460_v41 = vpack.c.bf16 %v344_v34, %v339_v30  ;;  %v349_v49 = vld [vmem:[#allocation2 + $0x240] sm:$0xff] }
  0x3f   : > { %1962 = vmatpush1.bf16.msra.mxu0 %v2432_v5  ;;  %1994 = vmatpush1.bf16.msra.mxu1 %v2436_v6  ;;  %v2462_v42 = vpack.c.bf16 %v353_v36, %v348_v35  ;;  %v347_v45 = vld [vmem:[#allocation2 + $0x230] sm:$0xff]  ;;  %v352_v46 = vld [vmem:[#allocation2 + $0x258] sm:$0xff]  ;;  %v2465_v47 = vpack.c.bf16 %v355_v38, %v350_v37  ;;  %v354_v50 = vld [vmem:[#allocation2 + $0x268] sm:$0xff] }
  0x40   : > { %1964 = vmatprep.subr.bf16.mxu0 %v2438_v7  ;;  %1996 = vmatprep.subr.bf16.mxu1 %v2441_v15  ;;  %v2468_v51 = vpack.c.bf16 %v352_v46, %v347_v45  ;;  %v2472_v52 = vpack.c.bf16 %v354_v50, %v349_v49  ;;  %v2484_v58 = vld [vmem:[%s260_s17] sm:$0xff]  ;;  %v286_v62 = vld [vmem:[#allocation2 + $0x48] sm:$0xff]  ;;  %v291_v3 = vld [vmem:[#allocation2 + $0x70] sm:$0xff] }
  0x41   : > { %999 = vperm.xlu1 %2206, %v2484_v58   ;;  %v281_v61 = vld [vmem:[#allocation2 + $0x20] sm:$0xff]  ;;  %v296_v10 = vld [vmem:[#allocation2 + $0x98] sm:$0xff]  ;;  %v306_v12 = vld [vmem:[#allocation2 + $0xe8] sm:$0xff] }
  0x42   : > { %v301_v11 = vld [vmem:[#allocation2 + $0xc0] sm:$0xff]  ;;  %v316_v17 = vld [vmem:[#allocation2 + $0x138] sm:$0xff]  ;;  %v326_v20 = vld [vmem:[#allocation2 + $0x188] sm:$0xff] }
  0x43   : > { %1966 = vmatpush1.bf16.msra.mxu0 %v2444_v22  ;;  %1998 = vmatpush1.bf16.msra.mxu1 %v2448_v25  ;;  %v2014_v16 = vpack.c.bf16 %v306_v12, %v301_v11  ;;  %v321_v19 = vld [vmem:[#allocation2 + $0x160] sm:$0xff]  ;;  %v336_v21 = vld [vmem:[#allocation2 + $0x1d8] sm:$0xff]  ;;  %v346_v27 = vld [vmem:[#allocation2 + $0x228] sm:$0xff] }
  0x44   : > { %1968 = vmatprep.subr.bf16.mxu0 %v2450_v26  ;;  %2000 = vmatprep.subr.bf16.mxu1 %v2453_v31  ;;  %v356_v29 = vld [vmem:[#allocation2 + $0x278] sm:$0xff]  ;;  %v800_v34 = vld [vmem:[%s3130_s1 + $0x48] sm:$0xff]  ;;  %v803_v46 = vld [vmem:[%s3130_s1 + $0x60] sm:$0xff] }
  0x45   : > { %2207 = vset.pattern.permute.xlu1 %v2275_v0  ;;  %v2011_v0 = vpack.c.bf16 %v296_v10, %v291_v3  ;;  %v805_v50 = vld [vmem:[%s3130_s1 + $0x70] sm:$0xff] }
  0x47   : > { %1970 = vmatpush1.bf16.msra.mxu0 %v2456_v39  ;;  %2002 = vmatpush1.bf16.msra.mxu1 %v2460_v41 }
  0x48   : > { %1972 = vmatprep.subr.bf16.mxu0 %v2462_v42  ;;  %2004 = vmatprep.subr.bf16.mxu1 %v2465_v47 }
  0x4b   : > { %1974 = vmatpush1.bf16.msra.mxu0 %v2468_v51  ;;  %2006 = vmatpush1.bf16.msra.mxu1 %v2472_v52 }
  0x4c   : > { %2007 = vmatprep.subr.bf16.mxu0 %v2278_v53  ;;  %2032 = vmatprep.subr.bf16.mxu1 %v2378_v4  ;;  %v2490_v4 = vpack.c.bf16 %v286_v62, %v281_v61 }
  0xaf   : > { %v2492_v2 = vpop.permute.xlu0 %273 }
  0xb0   : > { %vm275_vm0 = vcmp.eq.s32.totalorder %v2492_v2, %v2488_v63 }
  0xb1   : > { %1754 = vmatmul.mubr.msk.f32.vlgmr.msra.gmra.mrb[0].mxu0 %vm275_vm0, %v2280_v1  ;;  %1755 = vmatmul.mubr.msk.f32.vlgmr.msra.gmra.mrb[0].mxu1 %vm275_vm0, %v2280_v1 }
  0xb2   : > { %2009 = vmatpush3.bf16.msra.mxu0 %v2490_v4  ;;  %2034 = vmatpush1.bf16.msra.mxu1 %v2385_v13  ;;  %v311_v13 = vld [vmem:[#allocation2 + $0x110] sm:$0xff] }
  0xb3   : > { %2010 = vmatprep.subr.bf16.mxu0 %v2278_v53  ;;  %2036 = vmatprep.subr.bf16.mxu1 %v2390_v18  ;;  %v2017_v18 = vpack.c.bf16 %v316_v17, %v311_v13 }
  0xb4   : > { %1870 = vmatprep.mubr.msk.f32.mxu0 %vm2281_vm1, %v2276_v8  ;;  %638 = vmatprep.mubr.f32.mxu1 %v2276_v8 }
  0xb6   : > { %2012 = vmatpush3.bf16.msra.mxu0 %v2011_v0  ;;  %2038 = vmatpush1.bf16.msra.mxu1 %v2395_v24  ;;  %v2020_v24 = vpack.c.bf16 %v326_v20, %v321_v19  ;;  %v2283_v20 = vmov 683565275  }
  0xb7   : > { %2013 = vmatprep.subr.bf16.mxu0 %v2278_v53  ;;  %2040 = vmatprep.subr.bf16.mxu1 %v2403_v32  ;;  %v331_v32 = vld [vmem:[#allocation2 + $0x1b0] sm:$0xff] }
  0xb9   : > { %v788_v57 = vpop.permute.xlu1 %787 }
  0xba   : > { %2015 = vmatpush3.bf16.msra.mxu0 %v2014_v16  ;;  %2042 = vmatpush1.bf16.msra.mxu1 %v2408_v40  ;;  %v2023_v40 = vpack.c.bf16 %v336_v21, %v331_v32  ;;  %vm789_vm3 = vcmp.eq.s32.totalorder %v788_v57, %v2488_v63  ;;  %v2284_v32 = vmov 2475754826  }
  0xbb   : > { %2016 = vmatprep.subr.bf16.mxu0 %v2278_v53  ;;  %2044 = vmatprep.subr.bf16.mxu1 %v2414_v44  ;;  %v341_v44 = vld [vmem:[#allocation2 + $0x200] sm:$0xff] }
  0xbe   : > { %2018 = vmatpush3.bf16.msra.mxu0 %v2017_v18  ;;  %2046 = vmatpush1.bf16.msra.mxu1 %v2420_v54  ;;  %v2026_v54 = vpack.c.bf16 %v346_v27, %v341_v44  ;;  %v2285_v44 = vmov 2131351028  }
  0xbf   : > { %2019 = vmatprep.subr.bf16.mxu0 %v2278_v53  ;;  %2048 = vmatprep.subr.bf16.mxu1 %v2426_v56  ;;  %v351_v56 = vld [vmem:[#allocation2 + $0x250] sm:$0xff] }
  0xc2   : > { %2021 = vmatpush3.bf16.msra.mxu0 %v2020_v24  ;;  %2050 = vmatpush1.bf16.msra.mxu1 %v2432_v5  ;;  %v2029_v5 = vpack.c.bf16 %v356_v29, %v351_v56  ;;  %v2286_v56 = vmov 2102212464  }
  0xc3   : > { %2022 = vmatprep.subr.bf16.mxu0 %v2278_v53  ;;  %2052 = vmatprep.subr.bf16.mxu1 %v2438_v7  ;;  %v571_v7 = vpop.permute.xlu0 %570 }
  0xc4   : > { %vm572_vm2 = vcmp.eq.s32.totalorder %v571_v7, %v2488_v63  ;;  %v2666_v63 = vpop.permute.xlu1 %999 }
  0xc6   : > { %2024 = vmatpush3.bf16.msra.mxu0 %v2023_v40  ;;  %2054 = vmatpush1.bf16.msra.mxu1 %v2444_v22 }
  0xc7   : > { %2025 = vmatprep.subr.bf16.mxu0 %v2278_v53  ;;  %2056 = vmatprep.subr.bf16.mxu1 %v2450_v26  ;;  %v798_v26 = vld [vmem:[%s3130_s1 + $0x38] sm:$0xff] }
  0xca   : > { %2027 = vmatpush3.bf16.msra.mxu0 %v2026_v54  ;;  %2058 = vmatpush1.bf16.msra.mxu1 %v2456_v39 }
  0xcb   : > { %2028 = vmatprep.subr.bf16.mxu0 %v2278_v53  ;;  %2060 = vmatprep.subr.bf16.mxu1 %v2462_v42  ;;  %v802_v42 = vld [vmem:[%s3130_s1 + $0x58] sm:$0xff] }
  0xce   : > { %2030 = vmatpush3.bf16.msra.mxu0 %v2029_v5  ;;  %2062 = vmatpush1.bf16.msra.mxu1 %v2468_v51  ;;  %v806_v51 = vld [vmem:[%s3130_s1 + $0x78] sm:$0xff] }
  0xcf   : > { %2064 = vmatprep.subr.bf16.mxu0 %v2381_v9  ;;  %2095 = vmatprep.subr.bf16.mxu1 %v2278_v53 }
  0xd1   : > { %1871 = vmatmul.mubr.msk.f32.vlgmr.msra.gmra.mrb[2].mxu0 %vm275_vm0, %v2280_v1  ;;  %1757 = vmatmul.mubr.msk.f32.vlgmr.msra.gmra.mrb[2].mxu1 %vm572_vm2, %v2280_v1 }
  0xd2   : > { %2066 = vmatpush1.bf16.msra.mxu0 %v2387_v14  ;;  %2097 = vmatpush3.bf16.msra.mxu1 %v2490_v4 }
  0xd3   : > { %2068 = vmatprep.subr.bf16.mxu0 %v2393_v23  ;;  %2098 = vmatprep.subr.bf16.mxu1 %v2278_v53 }
  0xd4   : > { %709 = vmatprep.mubr.f32.mxu0 %v2276_v8  ;;  %1905 = vmatprep.mubr.msk.f32.mxu1 %vm2281_vm1, %v2276_v8 }
  0xd6   : > { %2070 = vmatpush1.bf16.msra.mxu0 %v2399_v28  ;;  %2100 = vmatpush3.bf16.msra.mxu1 %v2011_v0 }
  0xd7   : > { %2072 = vmatprep.subr.bf16.mxu0 %v2405_v33  ;;  %2101 = vmatprep.subr.bf16.mxu1 %v2278_v53  ;;  %v792_v33 = vld [vmem:[%s3130_s1 + $0x8] sm:$0xff] }
  0xda   : > { %2074 = vmatpush1.bf16.msra.mxu0 %v2412_v43  ;;  %2103 = vmatpush3.bf16.msra.mxu1 %v2014_v16 }
  0xdb   : > { %2076 = vmatprep.subr.bf16.mxu0 %v2417_v48  ;;  %2104 = vmatprep.subr.bf16.mxu1 %v2278_v53  ;;  %v793_v48 = vld [vmem:[%s3130_s1 + $0x10] sm:$0xff] }
  0xde   : > { %2078 = vmatpush1.bf16.msra.mxu0 %v2424_v55  ;;  %2106 = vmatpush3.bf16.msra.mxu1 %v2017_v18  ;;  %v794_v55 = vld [vmem:[%s3130_s1 + $0x18] sm:$0xff] }
  0xdf   : > { %2080 = vmatprep.subr.bf16.mxu0 %v2429_v60  ;;  %2107 = vmatprep.subr.bf16.mxu1 %v2278_v53  ;;  %v2123_v60 = vpack.c.bf16 %v794_v55, %v793_v48  ;;  %v2288_v48 = vmov 1326507024  }
  0xe2   : > { %2082 = vmatpush1.bf16.msra.mxu0 %v2436_v6  ;;  %2109 = vmatpush3.bf16.msra.mxu1 %v2020_v24  ;;  %v795_v6 = vld [vmem:[%s3130_s1 + $0x20] sm:$0xff] }
  0xe3   : > { %2084 = vmatprep.subr.bf16.mxu0 %v2441_v15  ;;  %2110 = vmatprep.subr.bf16.mxu1 %v2278_v53  ;;  %v796_v15 = vld [vmem:[%s3130_s1 + $0x28] sm:$0xff] }
  0xe4   : > { %v2126_v22 = vpack.c.bf16 %v796_v15, %v795_v6 }
  0xe6   : > { %2086 = vmatpush1.bf16.msra.mxu0 %v2448_v25  ;;  %2112 = vmatpush3.bf16.msra.mxu1 %v2023_v40  ;;  %v797_v25 = vld [vmem:[%s3130_s1 + $0x30] sm:$0xff] }
  0xe7   : > { %2088 = vmatprep.subr.bf16.mxu0 %v2453_v31  ;;  %2113 = vmatprep.subr.bf16.mxu1 %v2278_v53  ;;  %v2129_v30 = vpack.c.bf16 %v798_v26, %v797_v25  ;;  %v799_v31 = vld [vmem:[%s3130_s1 + $0x40] sm:$0xff] }
  0xe8   : > { %v2132_v35 = vpack.c.bf16 %v800_v34, %v799_v31 }
  0xea   : > { %2090 = vmatpush1.bf16.msra.mxu0 %v2460_v41  ;;  %2115 = vmatpush3.bf16.msra.mxu1 %v2026_v54  ;;  %v801_v41 = vld [vmem:[%s3130_s1 + $0x50] sm:$0xff] }
  0xeb   : > { %2092 = vmatprep.subr.bf16.mxu0 %v2465_v47  ;;  %2116 = vmatprep.subr.bf16.mxu1 %v2278_v53  ;;  %v2135_v45 = vpack.c.bf16 %v802_v42, %v801_v41  ;;  %v804_v47 = vld [vmem:[%s3130_s1 + $0x68] sm:$0xff] }
  0xec   : > { %v2138_v49 = vpack.c.bf16 %v804_v47, %v803_v46 }
  0xee   : > { %2094 = vmatpush1.bf16.msra.mxu0 %v2472_v52  ;;  %2118 = vmatpush3.bf16.msra.mxu1 %v2029_v5  ;;  %v2141_v52 = vpack.c.bf16 %v806_v51, %v805_v50 }
  0xef   : > { %2119 = vmatprep.subr.bf16.mxu0 %v2278_v53 }
  0xf1   : > { %1758 = vmatmul.mubr.msk.f32.vlgmr.msra.gmra.mrb[4].mxu0 %vm572_vm2, %v2280_v1  ;;  %1906 = vmatmul.mubr.msk.f32.vlgmr.msra.gmra.mrb[4].mxu1 %vm572_vm2, %v2280_v1 }
  0xf2   : > { %1940 = vmatprep.mubr.msk.f32.mxu0 %vm2281_vm1, %v2276_v8  ;;  %v791_v8 = vld [vmem:[%s3130_s1] sm:$0xff] }
  0xf3   : > { %v2120_v43 = vpack.c.bf16 %v792_v33, %v791_v8  ;;  %v2287_v8 = vmov 920167782  }
  0xf5   : > { %2121 = vmatpush3.bf16.msra.mxu0 %v2120_v43 }
  0xf6   : > { %2122 = vmatprep.subr.bf16.mxu0 %v2278_v53 }
  0xf9   : > { %2124 = vmatpush3.bf16.msra.mxu0 %v2123_v60 }
  0xfa   : > { %2125 = vmatprep.subr.bf16.mxu0 %v2278_v53 }
  0xfd   : > { %2127 = vmatpush3.bf16.msra.mxu0 %v2126_v22 }
  0xfe   : > { %2128 = vmatprep.subr.bf16.mxu0 %v2278_v53 }
 0x101   : > { %2130 = vmatpush3.bf16.msra.mxu0 %v2129_v30 }
 0x102   : > { %2131 = vmatprep.subr.bf16.mxu0 %v2278_v53 }
 0x105   : > { %2133 = vmatpush3.bf16.msra.mxu0 %v2132_v35 }
 0x106   : > { %2134 = vmatprep.subr.bf16.mxu0 %v2278_v53 }
 0x109   : > { %2136 = vmatpush3.bf16.msra.mxu0 %v2135_v45 }
 0x10a   : > { %2137 = vmatprep.subr.bf16.mxu0 %v2278_v53 }
 0x10d   : > { %2139 = vmatpush3.bf16.msra.mxu0 %v2138_v49 }
 0x10e   : > { %2140 = vmatprep.subr.bf16.mxu0 %v2278_v53 }
 0x111   : > { %2142 = vmatpush3.bf16.msra.mxu0 %v2141_v52 }
 0x114   : > { %1941 = vmatmul.mubr.msk.f32.vlgmr.msra.gmra.mrb[6].mxu0 %vm789_vm3, %v2280_v1 }
 0x184   : > { %v2575_v9 = vpop.f32.mrb[0].mxu0  ;;  %v2577_v14 = vpop.f32.mrb[0].mxu1 }
 0x185   : > { %v2579_v23 = vpop.f32.mrb[1].mxu0  ;;  %v2581_v28 = vpop.f32.mrb[1].mxu1  ;;  %v1002_v4 = vmul.f32 %v2666_v63, %v2577_v14 }
 0x186   : > { %1004 = vrot.lane.b32.xlu1 %v2581_v28, %s2282_s19 }
 0x18a   : > { %880 = vperm.xlu1 %2207, %v2484_v58  }
 0x18e   : > { %885 = vrot.lane.b32.xlu1 %v2579_v23, %s2282_s19 }
 0x1a4   : > { %v2622_v36 = vpop.f32.mrb[2].mxu0  ;;  %v2624_v37 = vpop.f32.mrb[2].mxu1 }
 0x1a5   : > { %1128 = vrot.lane.b32.xlu1 %v2622_v36, %s2282_s19  ;;  %v1872_v38 = vpop.f32.mrb[3].mxu0  ;;  %v2628_v39 = vpop.f32.mrb[3].mxu1 }
 0x1c4   : > { %v2653_v59 = vpop.f32.mrb[4].mxu0  ;;  %v2655_v61 = vpop.f32.mrb[4].mxu1 }
 0x1c5   : > { %v2657_v53 = vpop.f32.mrb[5].mxu0  ;;  %v1907_v62 = vpop.f32.mrb[5].mxu1 }
 0x1c6   : > { %1359 = vrot.lane.b32.xlu0 %v2657_v53, %s2282_s19 }
 0x1ca   : > { %1123 = vperm.xlu0 %2205, %v2484_v58  }
 0x1ce   : > { %1244 = vrot.lane.b32.xlu0 %v2628_v39, %s2282_s19 }
 0x1d2   : > { %1479 = vrot.lane.b32.xlu0 %v2655_v61, %s2282_s19 }
 0x1f8   : > { %v1005_v2 = vpop.permute.xlu1 %1004 }
 0x1f9   : > { %v2670_v3 = vadd.f32 %v1005_v2, %v1002_v4 }
 0x1fb   : > { %v1011_v10 = vand.u32 2139095040, %v2670_v3  ;;  %v1008_v58 = vand.u32 2147483647, %v2670_v3  ;;  %vm1010_vm1 = vcmp.lt.s32.totalorder %v2670_v3, 0 }
 0x1fd   : > { %v1012_v1 = vshrl.u32 %v1011_v10, 23  ;;  %v1015_v12 = vand.u32 8388607, %v1008_v58  ;;  %vm1009_vm2 = vcmp.le.f32.partialorder %v1008_v58, 0.7853982 }
 0x1ff   : > { %v1765_v0 = vadd.s32 4294967169, %v1012_v1  ;;  %v1016_v19 = vor.u32 8388608, %v1015_v12 }
 0x201   : > { %v1018_v11 = vadd.s32 1, %v1765_v0  ;;  %v1056_v49 = vshll.u32 %v1016_v19, 8 }
 0x203   : > { %vm1019_vm4 = vcmp.gt.s32.totalorder %v1018_v11, 0 }
 0x204   : > { %v1020_v16 = vsel %vm1019_vm4, %v1018_v11, 0 }
 0x205   : > { %v1022_v13 = vand.u32 31, %v1020_v16  ;;  %v1021_v17 = vshrl.u32 %v1020_v16, 5 }
 0x207   : > { %v1023_v18 = vsub.s32 32, %v1022_v13  ;;  %v1025_v24 = vshll.u32 %v2283_v20, %v1022_v13  ;;  %v1028_v21 = vshll.u32 %v2284_v32, %v1022_v13  ;;  %v1031_v54 = vshll.u32 %v2285_v44, %v1022_v13 }
 0x208   : > { %v1034_v7 = vshll.u32 %v2286_v56, %v1022_v13  ;;  %v1037_v43 = vshll.u32 %v2287_v8, %v1022_v13  ;;  %vm1040_vm5 = vcmp.lt.s32.totalorder %v1021_v17, 1  ;;  %vm1043_vm6 = vcmp.lt.s32.totalorder %v1021_v17, 4 }
 0x209   : > { %v1026_v40 = vshrl.u32 %v2284_v32, %v1023_v18  ;;  %v1029_v27 = vshrl.u32 %v2285_v44, %v1023_v18  ;;  %v1032_v29 = vshrl.u32 %v2286_v56, %v1023_v18  ;;  %v2682_v5 = vpop.permute.xlu1 %880  ;;  %v1035_v33 = vshrl.u32 %v2287_v8, %v1023_v18 }
 0x20a   : > { %v1038_v55 = vshrl.u32 %v2288_v48, %v1023_v18  ;;  %v883_v26 = vmul.f32 %v2682_v5, %v2579_v23  ;;  %v1024_v30 = vshrl.u32 %v2283_v20, %v1023_v18  ;;  %vm1042_vm7 = vcmp.lt.s32.totalorder %v1021_v17, 3 }
 0x20b   : > { %v1027_v60 = vor.u32 %v1026_v40, %v1025_v24  ;;  %v1030_v6 = vor.u32 %v1029_v27, %v1028_v21  ;;  %v1033_v15 = vor.u32 %v1032_v29, %v1031_v54  ;;  %v1036_v22 = vor.u32 %v1035_v33, %v1034_v7 }
 0x20c   : > { %v1039_v25 = vor.u32 %v1038_v55, %v1037_v43  ;;  %vm1041_vm8 = vcmp.lt.s32.totalorder %v1021_v17, 2 }
 0x20d   : > { %v1045_v31 = vsel %vm1043_vm6, %v1033_v15, 2102212464  ;;  %v1048_v34 = vsel %vm1040_vm5, %v1027_v60, %v1030_v6  ;;  %v1052_v35 = vsel %vm1040_vm5, %v1030_v6, %v1033_v15  ;;  %v886_v38 = vpop.permute.xlu1 %885  ;;  %v1049_v41 = vsel %vm1043_vm6, %v1036_v22, 920167782 }
 0x20e   : > { %v1053_v42 = vsel %vm1043_vm6, %v1039_v25, 1326507024  ;;  %v2693_v45 = vadd.f32 %v886_v38, %v883_v26  ;;  %v1050_v46 = vsel %vm1042_vm7, %v1033_v15, %v1049_v41  ;;  %v1044_v50 = vsel %vm1040_vm5, %v1024_v30, %v1027_v60 }
 0x20f   : > { %v1054_v47 = vsel %vm1042_vm7, %v1036_v22, %v1053_v42  ;;  %v1046_v23 = vsel %vm1042_vm7, %v1030_v6, %v1045_v31  ;;  %v1051_v51 = vsel %vm1041_vm8, %v1048_v34, %v1050_v46 }
 0x210   : > { %v1055_v52 = vsel %vm1041_vm8, %v1052_v35, %v1054_v47  ;;  %v2699_v4 = vmul.u32.u64.low %v1056_v49, %v1051_v51  ;;  %v2700_v2 = vmul.u32.u64.high %v1056_v49, %v1051_v51, %v2699_v4  ;;  %v892_v10 = vand.u32 2139095040, %v2693_v45 }
 0x211   : > { %v2696_v57 = vmul.u32.u64.low %v1056_v49, %v1055_v52  ;;  %v2697_v62 = vmul.u32.u64.high %v1056_v49, %v1055_v52, %v2696_v57  ;;  %v1047_v1 = vsel %vm1041_vm8, %v1044_v50, %v1046_v23  ;;  %v889_v0 = vand.u32 2147483647, %v2693_v45 }
 0x212   : > { %v893_v11 = vshrl.u32 %v892_v10, 23  ;;  %v1066_v12 = vadd.s32 1, %v2700_v2  ;;  %v1063_v16 = vmul.u32 %v1056_v49, %v1047_v1  ;;  %vm891_vm5 = vcmp.lt.s32.totalorder %v2693_v45, 0 }
 0x213   : > { %vm1065_vm9 = vc.u32 %v2697_v62, %v2699_v4  ;;  %v896_v18 = vand.u32 8388607, %v889_v0  ;;  %vm2780_vm6 = vcmp.le.f32.partialorder %v889_v0, 0.7853982 }
 0x214   : > { %v1761_v13 = vadd.s32 4294967169, %v893_v11  ;;  %v1067_v17 = vsel %vm1065_vm9, %v1066_v12, %v2700_v2 }
 0x215   : > { %v1068_v19 = vadd.s32 %v1067_v17, %v1063_v16  ;;  %v897_v40 = vor.u32 8388608, %v896_v18 }
 0x216   : > { %v899_v24 = vadd.s32 1, %v1761_v13 }
 0x217   : > { %v1069_v21 = vadd.s32 536870912, %v1068_v19  ;;  %v937_v15 = vshll.u32 %v897_v40, 8 }
 0x218   : > { %vm900_vm10 = vcmp.gt.s32.totalorder %v899_v24, 0 }
 0x219   : > { %v901_v27 = vsel %vm900_vm10, %v899_v24, 0  ;;  %v2711_v54 = vshrl.u32 %v1069_v21, 30 }
 0x21a   : > { %v903_v29 = vand.u32 31, %v901_v27  ;;  %v902_v33 = vshrl.u32 %v901_v27, 5 }
 0x21b   : > { %v1071_v7 = vshll.u32 %v2711_v54, 30 }
 0x21c   : > { %v904_v43 = vsub.s32 32, %v903_v29  ;;  %v906_v55 = vshll.u32 %v2283_v20, %v903_v29  ;;  %v909_v60 = vshll.u32 %v2284_v32, %v903_v29  ;;  %v912_v6 = vshll.u32 %v2285_v44, %v903_v29 }
 0x21d   : > { %v1072_v22 = vsub.s32 %v1068_v19, %v1071_v7  ;;  %v915_v30 = vshll.u32 %v2286_v56, %v903_v29  ;;  %v918_v35 = vshll.u32 %v2287_v8, %v903_v29  ;;  %vm921_vm11 = vcmp.lt.s32.totalorder %v902_v33, 1 }
 0x21e   : > { %v907_v25 = vshrl.u32 %v2284_v32, %v904_v43  ;;  %v910_v26 = vshrl.u32 %v2285_v44, %v904_v43  ;;  %v913_v31 = vshrl.u32 %v2286_v56, %v904_v43  ;;  %v916_v34 = vshrl.u32 %v2287_v8, %v904_v43 }
 0x21f   : > { %v919_v38 = vshrl.u32 %v2288_v48, %v904_v43  ;;  %v1074_v41 = vsub.s32 0, %v1072_v22  ;;  %v905_v47 = vshrl.u32 %v2283_v20, %v904_v43  ;;  %vm923_vm12 = vcmp.lt.s32.totalorder %v902_v33, 3 }
 0x220   : > { %v908_v42 = vor.u32 %v907_v25, %v906_v55  ;;  %v911_v46 = vor.u32 %v910_v26, %v909_v60  ;;  %v914_v49 = vor.u32 %v913_v31, %v912_v6  ;;  %v917_v50 = vor.u32 %v916_v34, %v915_v30 }
 0x221   : > { %v920_v23 = vor.u32 %v919_v38, %v918_v35  ;;  %v1766_v51 = vmin.u32 %v1074_v41, %v1072_v22  ;;  %vm924_vm13 = vcmp.lt.s32.totalorder %v902_v33, 4  ;;  %vm922_vm14 = vcmp.lt.s32.totalorder %v902_v33, 2 }
 0x222   : > { %v929_v52 = vsel %vm921_vm11, %v908_v42, %v911_v46  ;;  %v926_v57 = vsel %vm924_vm13, %v914_v49, 2102212464  ;;  %v930_v2 = vsel %vm924_vm13, %v917_v50, 920167782  ;;  %v933_v10 = vsel %vm921_vm11, %v911_v46, %v914_v49 }
 0x223   : > { %v934_v1 = vsel %vm924_vm13, %v920_v23, 1326507024  ;;  %v1076_v11 = vclz %v1766_v51  ;;  %v931_v12 = vsel %vm923_vm12, %v914_v49, %v930_v2  ;;  %v925_v13 = vsel %vm921_vm11, %v905_v47, %v908_v42 }
 0x224   : > { %v935_v16 = vsel %vm923_vm12, %v917_v50, %v934_v1  ;;  %v932_v17 = vsel %vm922_vm14, %v929_v52, %v931_v12  ;;  %v927_v24 = vsel %vm923_vm12, %v911_v46, %v926_v57  ;;  %v1064_v55 = vadd.s32 %v2699_v4, %v2697_v62 }
 0x225   : > { %v936_v18 = vsel %vm922_vm14, %v933_v10, %v935_v16  ;;  %v1767_v19 = vadd.s32 4294967294, %v1076_v11  ;;  %v2731_v27 = vmul.u32.u64.low %v937_v15, %v932_v17  ;;  %v2732_v29 = vmul.u32.u64.high %v937_v15, %v932_v17, %v2731_v27 }
 0x226   : > { %v2728_v21 = vmul.u32.u64.low %v937_v15, %v936_v18  ;;  %v2729_v40 = vmul.u32.u64.high %v937_v15, %v936_v18, %v2728_v21  ;;  %v928_v43 = vsel %vm922_vm14, %v925_v13, %v927_v24  ;;  %v1094_v23 = vsub.s32 4, %v2711_v54 }
 0x227   : > { %vm1768_vm15 = vcmp.lt.s32.totalorder %v1767_v19, 0  ;;  %v947_v33 = vadd.s32 1, %v2732_v29  ;;  %v944_v31 = vmul.u32 %v937_v15, %v928_v43  ;;  %v2758_v43 = vmul.f32 %v2682_v5, %v2628_v39 }
 0x228   : > { %v1079_v7 = vsel %vm1768_vm15, 0, %v1767_v19  ;;  %vm946_vm0 = vc.u32 %v2729_v40, %v2731_v27  ;;  %vm1100_vm12 = vweird.f32 %v2670_v3 }
 0x229   : > { %v1080_v60 = vsub.s32 32, %v1079_v7  ;;  %v1084_v6 = vsub.s32 4294967266, %v1079_v7  ;;  %v1081_v25 = vshll.u32 %v1072_v22, %v1079_v7  ;;  %v948_v34 = vsel %vm946_vm0, %v947_v33, %v2732_v29 }
 0x22a   : > { %v949_v41 = vadd.s32 %v948_v34, %v944_v31  ;;  %v1357_v22 = vmul.f32 %v2666_v63, %v2653_v59  ;;  %v1095_v63 = vsel %vm1010_vm1, %v1094_v23, %v2711_v54  ;;  %v945_v54 = vadd.s32 %v2731_v27, %v2729_v40 }
 0x22b   : > { %v1082_v26 = vshrl.u32 %v1064_v55, %v1080_v60  ;;  %v1085_v30 = vadd.s32 127, %v1084_v6  ;;  %v1097_v19 = vsel %vm1009_vm2, 0, %v1095_v63 }
 0x22c   : > { %v950_v46 = vadd.s32 536870912, %v949_v41  ;;  %v1101_v7 = vadd.s32 3, %v1097_v19 }
 0x22d   : > { %v1083_v35 = vor.u32 %v1082_v26, %v1081_v25  ;;  %v1086_v38 = vshll.u32 %v1085_v30, 23 }
 0x22e   : > { %v2739_v62 = vshrl.u32 %v950_v46, 30  ;;  %v2761_v26 = vand.u32 3, %v1101_v7 }
 0x22f   : > { %v1087_v42 = vor.u32 4788187, %v1086_v38  ;;  %v1090_v49 = vcvt.s32.f32 %v1083_v35 }
 0x230   : > { %v952_v50 = vshll.u32 %v2739_v62, 30  ;;  %v975_v30 = vsub.s32 4, %v2739_v62  ;;  %vm1103_vm11 = vcmp.lt.s32.totalorder %v2761_v26, 2  ;;  %vm1104_vm13 = vcmp.eq.s32.totalorder %v2761_v26, 0 }
 0x231   : > { %v1088_v47 = vand.u32 2147483647, %v1087_v42  ;;  %vm1107_vm14 = vcmp.eq.s32.totalorder %v2761_v26, 2 }
 0x232   : > { %v953_v51 = vsub.s32 %v949_v41, %v952_v50 }
 0x233   : > { %v1091_v4 = vmul.f32 %v1090_v49, %v1088_v47 }
 0x234   : > { %v955_v10 = vsub.s32 0, %v953_v51 }
 0x235   : > { %v1092_v15 = vxor.u32 2147483648, %v1091_v4 }
 0x236   : > { %v1762_v16 = vmin.u32 %v955_v10, %v953_v51 }
 0x237   : > { %v1093_v2 = vsel %vm1010_vm1, %v1092_v15, %v1091_v4 }
 0x238   : > { %v1360_v52 = vpop.permute.xlu0 %1359  ;;  %v1096_v12 = vsel %vm1009_vm2, %v2670_v3, %v1093_v2  ;;  %v957_v17 = vclz %v1762_v16 }
 0x239   : > { %v2746_v57 = vadd.f32 %v1360_v52, %v1357_v22  ;;  %2208 = vcosq.f32 %v1096_v12 }
 0x23a   : > { %v1763_v21 = vadd.s32 4294967294, %v957_v17  ;;  %2210 = vsinq.f32 %v1096_v12 }
 0x23b   : > { %v1363_v1 = vand.u32 2147483647, %v2746_v57  ;;  %v1366_v11 = vand.u32 2139095040, %v2746_v57  ;;  %vm1365_vm0 = vcmp.lt.s32.totalorder %v2746_v57, 0 }
 0x23c   : > { %vm1764_vm3 = vcmp.lt.s32.totalorder %v1763_v21, 0 }
 0x23d   : > { %v1367_v13 = vshrl.u32 %v1366_v11, 23  ;;  %v1370_v18 = vand.u32 8388607, %v1363_v1  ;;  %v960_v55 = vsel %vm1764_vm3, 0, %v1763_v21 }
 0x23e   : > { %v961_v60 = vsub.s32 32, %v960_v55  ;;  %v965_v6 = vsub.s32 4294967266, %v960_v55  ;;  %v962_v31 = vshll.u32 %v953_v51, %v960_v55 }
 0x23f   : > { %v1777_v24 = vadd.s32 4294967169, %v1367_v13  ;;  %v1371_v58 = vor.u32 8388608, %v1370_v18 }
 0x240   : > { %v963_v34 = vshrl.u32 %v945_v54, %v961_v60  ;;  %v966_v35 = vadd.s32 127, %v965_v6 }
 0x241   : > { %v1373_v29 = vadd.s32 1, %v1777_v24  ;;  %v2764_v38 = vshll.u32 %v1371_v58, 8 }
 0x242   : > { %v964_v41 = vor.u32 %v963_v34, %v962_v31  ;;  %v967_v42 = vshll.u32 %v966_v35, 23  ;;  %v976_v35 = vsel %vm891_vm5, %v975_v30, %v2739_v62 }
 0x243   : > { %vm1374_vm4 = vcmp.gt.s32.totalorder %v1373_v29, 0  ;;  %v2209_v24 = vpop.eup %2208 }
 0x244   : > { %v1375_v33 = vsel %vm1374_vm4, %v1373_v29, 0  ;;  %v968_v15 = vor.u32 4788187, %v967_v42  ;;  %v971_v10 = vcvt.s32.f32 %v964_v41  ;;  %v2211_v0 = vpop.eup %2210  ;;  %v1108_v62 = vxor.u32 2147483648, %v2209_v24 }
 0x245   : > { %v1377_v25 = vand.u32 31, %v1375_v33  ;;  %v1376_v39 = vshrl.u32 %v1375_v33, 5  ;;  %vm2879_vm4 = vcmp.le.f32.partialorder %v1363_v1, 0.7853982 }
 0x246   : > { %v969_v13 = vand.u32 2147483647, %v968_v15 }
 0x247   : > { %v1378_v5 = vsub.s32 32, %v1377_v25  ;;  %v1380_v40 = vshll.u32 %v2283_v20, %v1377_v25  ;;  %v1383_v27 = vshll.u32 %v2284_v32, %v1377_v25  ;;  %v1386_v46 = vshll.u32 %v2285_v44, %v1377_v25 }
 0x248   : > { %v1389_v47 = vshll.u32 %v2286_v56, %v1377_v25  ;;  %v1392_v22 = vshll.u32 %v2287_v8, %v1377_v25  ;;  %vm1395_vm7 = vcmp.lt.s32.totalorder %v1376_v39, 1  ;;  %vm1396_vm8 = vcmp.lt.s32.totalorder %v1376_v39, 2 }
 0x249   : > { %v1381_v49 = vshrl.u32 %v2284_v32, %v1378_v5  ;;  %v1384_v4 = vshrl.u32 %v2285_v44, %v1378_v5  ;;  %v1387_v50 = vshrl.u32 %v2286_v56, %v1378_v5  ;;  %v1124_v23 = vpop.permute.xlu0 %1123  ;;  %v1379_v51 = vshrl.u32 %v2283_v20, %v1378_v5 }
 0x24a   : > { %v1390_v52 = vshrl.u32 %v2287_v8, %v1378_v5  ;;  %v1393_v2 = vshrl.u32 %v2288_v48, %v1378_v5  ;;  %vm1397_vm9 = vcmp.lt.s32.totalorder %v1376_v39, 3  ;;  %vm1398_vm10 = vcmp.lt.s32.totalorder %v1376_v39, 4  ;;  %v1129_v5 = vpop.permute.xlu1 %1128 }
 0x24b   : > { %v1382_v11 = vor.u32 %v1381_v49, %v1380_v40  ;;  %v1385_v63 = vor.u32 %v1384_v4, %v1383_v27  ;;  %v1388_v12 = vor.u32 %v1387_v50, %v1386_v46  ;;  %v1126_v6 = vmul.f32 %v1124_v23, %v2622_v36 }
 0x24c   : > { %v1391_v17 = vor.u32 %v1390_v52, %v1389_v47  ;;  %v1394_v18 = vor.u32 %v1393_v2, %v1392_v22  ;;  %v972_v25 = vmul.f32 %v971_v10, %v969_v13  ;;  %v1105_v49 = vxor.u32 2147483648, %v2211_v0 }
 0x24d   : > { %v1403_v19 = vsel %vm1395_vm7, %v1382_v11, %v1385_v63  ;;  %v1399_v21 = vsel %vm1395_vm7, %v1379_v51, %v1382_v11  ;;  %v1400_v29 = vsel %vm1398_vm10, %v1388_v12, 2102212464  ;;  %v1407_v58 = vsel %vm1395_vm7, %v1385_v63, %v1388_v12  ;;  %v1245_v33 = vpop.permute.xlu0 %1244 }
 0x24e   : > { %v1404_v7 = vsel %vm1398_vm10, %v1391_v17, 920167782  ;;  %v1401_v54 = vsel %vm1397_vm9, %v1385_v63, %v1400_v29  ;;  %v1408_v60 = vsel %vm1398_vm10, %v1394_v18, 1326507024  ;;  %v2804_v47 = vadd.f32 %v1129_v5, %v1126_v6 }
 0x24f   : > { %v1405_v55 = vsel %vm1397_vm9, %v1388_v12, %v1404_v7  ;;  %v1409_v34 = vsel %vm1397_vm9, %v1391_v17, %v1408_v60  ;;  %v1402_v40 = vsel %vm1396_vm8, %v1399_v21, %v1401_v54  ;;  %v2809_v30 = vadd.f32 %v1245_v33, %v2758_v43 }
 0x250   : > { %v1406_v31 = vsel %vm1396_vm8, %v1403_v19, %v1405_v55  ;;  %v1410_v27 = vsel %vm1396_vm8, %v1407_v58, %v1409_v34  ;;  %v973_v39 = vxor.u32 2147483648, %v972_v25  ;;  %v1418_v4 = vmul.u32 %v2764_v38, %v1402_v40 }
 0x251   : > { %v2797_v41 = vmul.u32.u64.low %v2764_v38, %v1406_v31  ;;  %v2798_v42 = vmul.u32.u64.high %v2764_v38, %v1406_v31, %v2797_v41  ;;  %v2801_v36 = vmul.u32.u64.low %v2764_v38, %v1410_v27  ;;  %v2802_v46 = vmul.u32.u64.high %v2764_v38, %v1410_v27, %v2801_v36  ;;  %v1480_v10 = vpop.permute.xlu0 %1479 }
 0x252   : > { %v1135_v50 = vand.u32 2139095040, %v2804_v47  ;;  %v978_v22 = vsel %vm2780_vm6, 0, %v976_v35  ;;  %v1106_v51 = vsel %vm1104_vm13, %v2209_v24, %v1105_v49  ;;  %v1109_v52 = vsel %vm1107_vm14, %v1108_v62, %v2211_v0 }
 0x253   : > { %v1421_v15 = vadd.s32 1, %v2798_v42  ;;  %v1248_v2 = vand.u32 2147483647, %v2809_v30  ;;  %vm1420_vm15 = vc.u32 %v2802_v46, %v2797_v41  ;;  %v1477_v43 = vmul.f32 %v1124_v23, %v2655_v61 }
 0x254   : > { %v1136_v11 = vshrl.u32 %v1135_v50, 23  ;;  %v1110_v38 = vsel %vm1103_vm11, %v1106_v51, %v1109_v52  ;;  %v1251_v13 = vand.u32 2139095040, %v2809_v30  ;;  %v974_v24 = vsel %vm891_vm5, %v973_v39, %v972_v25 }
 0x255   : > { %v1422_v63 = vsel %vm1420_vm15, %v1421_v15, %v2798_v42  ;;  %v1111_v12 = vsel %vm1100_vm12, nan, %v1110_v38  ;;  %v2826_v19 = vadd.f32 %v1480_v10, %v1477_v43  ;;  %v1255_v26 = vand.u32 8388607, %v1248_v2 }
 0x256   : > { %v1423_v17 = vadd.s32 %v1422_v63, %v1418_v4  ;;  %v1769_v18 = vadd.s32 4294967169, %v1136_v11  ;;  %1113 = vrot.lane.b32.xlu1 %v1111_v12, %s2282_s19  ;;  %v1252_v61 = vshrl.u32 %v1251_v13, 23  ;;  %v982_v23 = vadd.s32 3, %v978_v22 }
 0x257   : > { %v1483_v3 = vand.u32 2147483647, %v2826_v19  ;;  %v1486_v58 = vand.u32 2139095040, %v2826_v19  ;;  %v977_v54 = vsel %vm2780_vm6, %v2693_v45, %v974_v24  ;;  %v1256_v55 = vor.u32 8388608, %v1255_v26 }
 0x258   : > { %v1424_v21 = vadd.s32 536870912, %v1423_v17  ;;  %v1142_v29 = vadd.s32 1, %v1769_v18  ;;  %v1773_v7 = vadd.s32 4294967169, %v1252_v61  ;;  %v2838_v33 = vand.u32 3, %v982_v23 }
 0x259   : > { %v1487_v6 = vshrl.u32 %v1486_v58, 23  ;;  %v2844_v34 = vand.u32 8388607, %v1483_v3  ;;  %v1132_v35 = vand.u32 2147483647, %v2804_v47  ;;  %2212 = vcosq.f32 %v977_v54 }
 0x25a   : > { %v1425_v0 = vshrl.u32 %v1424_v21, 30  ;;  %vm1143_vm1 = vcmp.gt.s32.totalorder %v1142_v29, 0  ;;  %v1258_v60 = vadd.s32 1, %v1773_v7  ;;  %v1419_v16 = vadd.s32 %v2797_v41, %v2802_v46 }
 0x25b   : > { %v2840_v31 = vsel %vm1143_vm1, %v1142_v29, 0  ;;  %v1781_v5 = vadd.s32 4294967169, %v1487_v6  ;;  %2214 = vsinq.f32 %v977_v54  ;;  %v2853_v39 = vshll.u32 %v1256_v55, 8 }
 0x25c   : > { %v1426_v25 = vshll.u32 %v1425_v0, 30  ;;  %vm1259_vm2 = vcmp.gt.s32.totalorder %v1258_v60, 0  ;;  %v1449_v40 = vsub.s32 4, %v1425_v0  ;;  %v2851_v36 = vand.u32 31, %v2840_v31 }
 0x25d   : > { %v1260_v42 = vsel %vm1259_vm2, %v1258_v60, 0  ;;  %v1491_v50 = vor.u32 8388608, %v2844_v34  ;;  %v1493_v22 = vadd.s32 1, %v1781_v5  ;;  %v2859_v15 = vand.u32 8388607, %v1132_v35 }
 0x25e   : > { %v2848_v27 = vsub.s32 %v1423_v17, %v1426_v25  ;;  %v1261_v49 = vshrl.u32 %v1260_v42, 5  ;;  %v1262_v62 = vand.u32 31, %v1260_v42  ;;  %v2865_v52 = vsel %vm1365_vm0, %v1449_v40, %v1425_v0 }
 0x25f   : > { %vm1494_vm9 = vcmp.gt.s32.totalorder %v1493_v22, 0  ;;  %vm985_vm10 = vcmp.eq.s32.totalorder %v2838_v33, 0  ;;  %vm988_vm12 = vcmp.eq.s32.totalorder %v2838_v33, 2  ;;  %vm984_vm13 = vcmp.lt.s32.totalorder %v2838_v33, 2 }
 0x260   : > { %v1429_v4 = vsub.s32 0, %v2848_v27  ;;  %v1263_v41 = vsub.s32 32, %v1262_v62  ;;  %v1265_v46 = vshll.u32 %v2283_v20, %v1262_v62  ;;  %v1268_v51 = vshll.u32 %v2284_v32, %v1262_v62 }
 0x261   : > { %v1271_v11 = vshll.u32 %v2285_v44, %v1262_v62  ;;  %v1274_v43 = vshll.u32 %v2286_v56, %v1262_v62  ;;  %v1277_v38 = vshll.u32 %v2287_v8, %v1262_v62  ;;  %vm1280_vm3 = vcmp.lt.s32.totalorder %v1261_v49, 1 }
 0x262   : > { %v1778_v10 = vmin.u32 %v1429_v4, %v2848_v27  ;;  %v1266_v63 = vshrl.u32 %v2284_v32, %v1263_v41  ;;  %v1269_v12 = vshrl.u32 %v2285_v44, %v1263_v41  ;;  %v1272_v13 = vshrl.u32 %v2286_v56, %v1263_v41 }
 0x263   : > { %v1264_v18 = vshrl.u32 %v2283_v20, %v1263_v41  ;;  %v1275_v24 = vshrl.u32 %v2287_v8, %v1263_v41  ;;  %v1278_v61 = vshrl.u32 %v2288_v48, %v1263_v41  ;;  %vm1282_vm5 = vcmp.lt.s32.totalorder %v1261_v49, 3  ;;  %v2883_v54 = vpop.eup %2212 }
 0x264   : > { %v1431_v17 = vclz %v1778_v10  ;;  %v1267_v23 = vor.u32 %v1266_v63, %v1265_v46  ;;  %v1270_v21 = vor.u32 %v1269_v12, %v1268_v51  ;;  %v1273_v29 = vor.u32 %v1272_v13, %v1271_v11 }
 0x265   : > { %v1276_v58 = vor.u32 %v1275_v24, %v1274_v43  ;;  %v1279_v0 = vor.u32 %v1278_v61, %v1277_v38  ;;  %vm1283_vm6 = vcmp.lt.s32.totalorder %v1261_v49, 4  ;;  %v2888_v25 = vpop.eup %2214  ;;  %vm1281_vm8 = vcmp.lt.s32.totalorder %v1261_v49, 2 }
 0x266   : > { %v1779_v7 = vadd.s32 4294967294, %v1431_v17  ;;  %v1284_v55 = vsel %vm1280_vm3, %v1264_v18, %v1267_v23  ;;  %v1285_v60 = vsel %vm1283_vm6, %v1273_v29, 2102212464  ;;  %v1288_v6 = vsel %vm1280_vm3, %v1267_v23, %v1270_v21 }
 0x267   : > { %v1292_v1 = vsel %vm1280_vm3, %v1270_v21, %v1273_v29  ;;  %v1286_v34 = vsel %vm1282_vm5, %v1270_v21, %v1285_v60  ;;  %v1289_v5 = vsel %vm1283_vm6, %v1276_v58, 920167782  ;;  %v1293_v40 = vsel %vm1283_vm6, %v1279_v0, 1326507024 }
 0x268   : > { %vm1780_vm7 = vcmp.lt.s32.totalorder %v1779_v7, 0  ;;  %v1290_v62 = vsel %vm1282_vm5, %v1273_v29, %v1289_v5  ;;  %v1294_v4 = vsel %vm1282_vm5, %v1276_v58, %v1293_v40  ;;  %v1287_v51 = vsel %vm1281_vm8, %v1284_v55, %v1286_v34 }
 0x269   : > { %v1434_v42 = vsel %vm1780_vm7, 0, %v1779_v7  ;;  %v1291_v10 = vsel %vm1281_vm8, %v1288_v6, %v1290_v62  ;;  %v1295_v43 = vsel %vm1281_vm8, %v1292_v1, %v1294_v4  ;;  %v2904_v49 = vsub.s32 32, %v2851_v36 }
 0x26a   : > { %v1435_v41 = vsub.s32 32, %v1434_v42  ;;  %v1439_v46 = vsub.s32 4294967266, %v1434_v42  ;;  %v1436_v11 = vshll.u32 %v2848_v27, %v1434_v42  ;;  %v2906_v24 = vshll.u32 %v1491_v50, 8 }
 0x26b   : > { %v2895_v38 = vmul.u32.u64.low %v2853_v39, %v1291_v10  ;;  %v2896_v63 = vmul.u32.u64.high %v2853_v39, %v1291_v10, %v2895_v38  ;;  %v2900_v17 = vmul.u32.u64.low %v2853_v39, %v1295_v43  ;;  %v2901_v18 = vmul.u32.u64.high %v2853_v39, %v1295_v43, %v2900_v17 }
 0x26c   : > { %v1437_v12 = vshrl.u32 %v1419_v16, %v1435_v41  ;;  %v1440_v13 = vadd.s32 127, %v1439_v46  ;;  %v1452_v27 = vsel %vm2879_vm4, 0, %v2865_v52  ;;  %v1303_v16 = vmul.u32 %v2853_v39, %v1287_v51 }
 0x26d   : > { %v1495_v21 = vsel %vm1494_vm9, %v1493_v22, 0  ;;  %v1306_v29 = vadd.s32 1, %v2896_v63  ;;  %v986_v58 = vxor.u32 2147483648, %v2888_v25  ;;  %v989_v0 = vxor.u32 2147483648, %v2883_v54 }
 0x26e   : > { %v1438_v61 = vor.u32 %v1437_v12, %v1436_v11  ;;  %v1441_v23 = vshll.u32 %v1440_v13, 23  ;;  %v1497_v7 = vand.u32 31, %v1495_v21  ;;  %vm1305_vm11 = vc.u32 %v2901_v18, %v2895_v38 }
 0x26f   : > { %v1496_v55 = vshrl.u32 %v1495_v21, 5  ;;  %v2918_v60 = vadd.s32 3, %v1452_v27  ;;  %v1307_v6 = vsel %vm1305_vm11, %v1306_v29, %v2896_v63  ;;  %vm981_vm14 = vweird.f32 %v2693_v45 }
 0x270   : > { %v1442_v50 = vor.u32 4788187, %v1441_v23  ;;  %v1445_v52 = vcvt.s32.f32 %v1438_v61  ;;  %v1498_v1 = vsub.s32 32, %v1497_v7  ;;  %v1500_v39 = vshll.u32 %v2283_v20, %v1497_v7 }
 0x271   : > { %v1308_v34 = vadd.s32 %v1307_v6, %v1303_v16  ;;  %v1503_v5 = vshll.u32 %v2284_v32, %v1497_v7  ;;  %v1506_v40 = vshll.u32 %v2285_v44, %v1497_v7  ;;  %v1509_v41 = vshll.u32 %v2286_v56, %v1497_v7 }
 0x272   : > { %v1443_v22 = vand.u32 2147483647, %v1442_v50  ;;  %v1501_v42 = vshrl.u32 %v2284_v32, %v1498_v1  ;;  %v1504_v62 = vshrl.u32 %v2285_v44, %v1498_v1  ;;  %v1507_v4 = vshrl.u32 %v2286_v56, %v1498_v1 }
 0x273   : > { %v1309_v51 = vadd.s32 536870912, %v1308_v34  ;;  %v1510_v10 = vshrl.u32 %v2287_v8, %v1498_v1  ;;  %v1512_v11 = vshll.u32 %v2287_v8, %v1497_v7  ;;  %v1513_v13 = vshrl.u32 %v2288_v48, %v1498_v1 }
 0x274   : > { %v1446_v46 = vmul.f32 %v1445_v52, %v1443_v22  ;;  %v1502_v43 = vor.u32 %v1501_v42, %v1500_v39  ;;  %v1505_v63 = vor.u32 %v1504_v62, %v1503_v5  ;;  %v1508_v12 = vor.u32 %v1507_v4, %v1506_v40 }
 0x275   : > { %v2934_v27 = vshrl.u32 %v1309_v51, 30  ;;  %v1511_v61 = vor.u32 %v1510_v10, %v1509_v41  ;;  %v987_v23 = vsel %vm985_vm10, %v2883_v54, %v986_v58  ;;  %v1499_v16 = vshrl.u32 %v2283_v20, %v1498_v1 }
 0x276   : > { %v1447_v17 = vxor.u32 2147483648, %v1446_v46  ;;  %v1514_v21 = vor.u32 %v1513_v13, %v1512_v11  ;;  %vm1515_vm15 = vcmp.lt.s32.totalorder %v1496_v55, 1  ;;  %vm1518_vm1 = vcmp.lt.s32.totalorder %v1496_v55, 4 }
 0x277   : > { %v1311_v29 = vshll.u32 %v2934_v27, 30  ;;  %vm1516_vm2 = vcmp.lt.s32.totalorder %v1496_v55, 2  ;;  %vm1517_vm3 = vcmp.lt.s32.totalorder %v1496_v55, 3  ;;  %v1520_v7 = vsel %vm1518_vm1, %v1508_v12, 2102212464 }
 0x278   : > { %v1448_v50 = vsel %vm1365_vm0, %v1447_v17, %v1446_v46  ;;  %v1523_v52 = vsel %vm1515_vm15, %v1502_v43, %v1505_v63  ;;  %v1524_v6 = vsel %vm1518_vm1, %v1511_v61, 920167782  ;;  %v1527_v39 = vsel %vm1515_vm15, %v1505_v63, %v1508_v12 }
 0x279   : > { %v2943_v22 = vsub.s32 %v1308_v34, %v1311_v29  ;;  %v1519_v5 = vsel %vm1515_vm15, %v1499_v16, %v1502_v43  ;;  %v1525_v54 = vsel %vm1517_vm3, %v1508_v12, %v1524_v6  ;;  %v1528_v58 = vsel %vm1518_vm1, %v1514_v21, 1326507024 }
 0x27a   : > { %v1521_v1 = vsel %vm1517_vm3, %v1505_v63, %v1520_v7  ;;  %v1526_v40 = vsel %vm1516_vm2, %v1523_v52, %v1525_v54  ;;  %v1529_v42 = vsel %vm1517_vm3, %v1511_v61, %v1528_v58  ;;  %v990_v62 = vsel %vm988_vm12, %v989_v0, %v2888_v25  ;;  %v2995_v7 = vpop.f32.mrb[6].mxu0 }
 0x27b   : > { %v1314_v4 = vsub.s32 0, %v2943_v22  ;;  %v1530_v41 = vsel %vm1516_vm2, %v1527_v39, %v1529_v42  ;;  %v2952_v46 = vmul.u32.u64.low %v2906_v24, %v1526_v40  ;;  %v2953_v51 = vmul.u32.u64.high %v2906_v24, %v1526_v40, %v2952_v46  ;;  %v1942_v6 = vpop.f32.mrb[7].mxu0 }
 0x27c   : > { %v2957_v34 = vmul.u32.u64.low %v2906_v24, %v1530_v41  ;;  %v2958_v10 = vmul.u32.u64.high %v2906_v24, %v1530_v41, %v2957_v34  ;;  %v991_v11 = vsel %vm984_vm13, %v987_v23, %v990_v62  ;;  %v1451_v25 = vsel %vm2879_vm4, %v2746_v57, %v1448_v50 }
 0x27d   : > { %v1774_v0 = vmin.u32 %v1314_v4, %v2943_v22  ;;  %v1522_v43 = vsel %vm1516_vm2, %v1519_v5, %v1521_v1  ;;  %v992_v63 = vsel %vm981_vm14, nan, %v991_v11  ;;  %2216 = vcosq.f32 %v1451_v25 }
 0x27e   : > { %994 = vrot.lane.b32.xlu1 %v992_v63, %s2282_s19  ;;  %2218 = vsinq.f32 %v1451_v25  ;;  %v2971_v12 = vshrl.u32 %v2840_v31, 5  ;;  %v1541_v13 = vadd.s32 1, %v2953_v51  ;;  %v1457_v26 = vand.u32 3, %v2918_v60 }
 0x27f   : > { %v1316_v33 = vclz %v1774_v0  ;;  %v1538_v17 = vmul.u32 %v2906_v24, %v1522_v43  ;;  %vm1540_vm0 = vc.u32 %v2958_v10, %v2952_v46  ;;  %v1140_v45 = vor.u32 8388608, %v2859_v15 }
 0x280   : > { %v1148_v55 = vshrl.u32 %v2283_v20, %v2904_v49  ;;  %v1304_v61 = vadd.s32 %v2895_v38, %v2901_v18  ;;  %v1542_v23 = vsel %vm1540_vm0, %v1541_v13, %v2953_v51  ;;  %v1149_v16 = vshll.u32 %v2283_v20, %v2851_v36 }
 0x281   : > { %v1775_v31 = vadd.s32 4294967294, %v1316_v33  ;;  %v1543_v60 = vadd.s32 %v1542_v23, %v1538_v17  ;;  %v1334_v24 = vsub.s32 4, %v2934_v27  ;;  %v1150_v21 = vshrl.u32 %v2284_v32, %v2904_v49 }
 0x282   : > { %v1153_v29 = vshrl.u32 %v2285_v44, %v2904_v49  ;;  %vm1458_vm5 = vcmp.lt.s32.totalorder %v1457_v26, 2  ;;  %v1152_v38 = vshll.u32 %v2284_v32, %v2851_v36  ;;  %v1156_v18 = vshrl.u32 %v2286_v56, %v2904_v49 }
 0x283   : > { %vm1776_vm4 = vcmp.lt.s32.totalorder %v1775_v31, 0  ;;  %v1544_v50 = vadd.s32 536870912, %v1543_v60  ;;  %vm1455_vm6 = vweird.f32 %v2746_v57  ;;  %vm1459_vm7 = vcmp.eq.s32.totalorder %v1457_v26, 0 }
 0x284   : > { %v1319_v20 = vsel %vm1776_vm4, 0, %v1775_v31  ;;  %v1159_v52 = vshrl.u32 %v2287_v8, %v2904_v49  ;;  %vm1462_vm8 = vcmp.eq.s32.totalorder %v1457_v26, 2  ;;  %v1155_v32 = vshll.u32 %v2285_v44, %v2851_v36 }
 0x285   : > { %v1320_v39 = vsub.s32 32, %v1319_v20  ;;  %v1324_v5 = vsub.s32 4294967266, %v1319_v20  ;;  %v3002_v54 = vshrl.u32 %v1544_v50, 30  ;;  %v1151_v58 = vor.u32 %v1150_v21, %v1149_v16 }
 0x286   : > { %v1154_v1 = vor.u32 %v1153_v29, %v1152_v38  ;;  %v1158_v40 = vshll.u32 %v2286_v56, %v2851_v36  ;;  %v1321_v62 = vshll.u32 %v2943_v22, %v1319_v20  ;;  %v1157_v51 = vor.u32 %v1156_v18, %v1155_v32 }
 0x287   : > { %v2217_v42 = vpop.eup %2216  ;;  %v1322_v4 = vshrl.u32 %v1304_v61, %v1320_v39  ;;  %v1325_v41 = vadd.s32 127, %v1324_v5  ;;  %v1546_v11 = vshll.u32 %v3002_v54, 30  ;;  %v1162_v44 = vshrl.u32 %v2288_v48, %v2904_v49 }
 0x288   : > { %v2219_v34 = vpop.eup %2218  ;;  %v1463_v25 = vxor.u32 2147483648, %v2217_v42  ;;  %v1160_v0 = vor.u32 %v1159_v52, %v1158_v40  ;;  %v1161_v56 = vshll.u32 %v2287_v8, %v2851_v36  ;;  %vm1164_vm9 = vcmp.lt.s32.totalorder %v2971_v12, 1 }
 0x289   : > { %v1323_v43 = vor.u32 %v1322_v4, %v1321_v62  ;;  %v1326_v63 = vshll.u32 %v1325_v41, 23  ;;  %v1460_v33 = vxor.u32 2147483648, %v2219_v34  ;;  %v3012_v13 = vsub.s32 %v1543_v60, %v1546_v11 }
 0x28a   : > { %v1464_v22 = vsel %vm1462_vm8, %v1463_v25, %v2219_v34  ;;  %vm1165_vm10 = vcmp.lt.s32.totalorder %v2971_v12, 2  ;;  %v1163_v31 = vor.u32 %v1162_v44, %v1161_v56  ;;  %vm1166_vm11 = vcmp.lt.s32.totalorder %v2971_v12, 3 }
 0x28b   : > { %v1327_v17 = vor.u32 4788187, %v1326_v63  ;;  %v1461_v61 = vsel %vm1459_vm7, %v2217_v42, %v1460_v33  ;;  %v1330_v48 = vcvt.s32.f32 %v1323_v43  ;;  %v1549_v49 = vsub.s32 0, %v3012_v13 }
 0x28c   : > { %v1465_v23 = vsel %vm1458_vm5, %v1461_v61, %v1464_v22  ;;  %vm1167_vm12 = vcmp.lt.s32.totalorder %v2971_v12, 4  ;;  %v1172_v60 = vsel %vm1164_vm9, %v1151_v58, %v1154_v1  ;;  %v1168_v29 = vsel %vm1164_vm9, %v1148_v55, %v1151_v58 }
 0x28d   : > { %v1328_v8 = vand.u32 2147483647, %v1327_v17  ;;  %v1466_v36 = vsel %vm1455_vm6, nan, %v1465_v23  ;;  %v1169_v16 = vsel %vm1167_vm12, %v1157_v51, 2102212464  ;;  %v1782_v21 = vmin.u32 %v1549_v49, %v3012_v13 }
 0x28e   : > { %1468 = vrot.lane.b32.xlu0 %v1466_v36, %s2282_s19  ;;  %v1173_v38 = vsel %vm1167_vm12, %v1160_v0, 920167782  ;;  %v1176_v26 = vsel %vm1164_vm9, %v1154_v1, %v1157_v51  ;;  %v1177_v20 = vsel %vm1167_vm12, %v1163_v31, 1326507024  ;;  %v1180_v50 = vshll.u32 %v1140_v45, 8 }
 0x28f   : > { %v1331_v18 = vmul.f32 %v1330_v48, %v1328_v8  ;;  %v1174_v57 = vsel %vm1166_vm11, %v1157_v51, %v1173_v38  ;;  %v1551_v52 = vclz %v1782_v21  ;;  %v1170_v6 = vsel %vm1166_vm11, %v1154_v1, %v1169_v16 }
 0x290   : > { %v1175_v39 = vsel %vm1165_vm10, %v1172_v60, %v1174_v57  ;;  %v1178_v55 = vsel %vm1166_vm11, %v1160_v0, %v1177_v20  ;;  %vm1250_vm13 = vcmp.lt.s32.totalorder %v2809_v30, 0  ;;  %vm3053_vm14 = vcmp.le.f32.partialorder %v1248_v2, 0.7853982 }
 0x291   : > { %v1332_v5 = vxor.u32 2147483648, %v1331_v18  ;;  %v1179_v32 = vsel %vm1165_vm10, %v1176_v26, %v1178_v55  ;;  %v3044_v58 = vmul.u32.u64.low %v1180_v50, %v1175_v39  ;;  %v3045_v40 = vmul.u32.u64.high %v1180_v50, %v1175_v39, %v3044_v58 }
 0x292   : > { %v1783_v15 = vadd.s32 4294967294, %v1551_v52  ;;  %v3048_v45 = vmul.u32.u64.low %v1180_v50, %v1179_v32  ;;  %v3049_v42 = vmul.u32.u64.high %v1180_v50, %v1179_v32, %v3048_v45  ;;  %v1335_v4 = vsel %vm1250_vm13, %v1334_v24, %v2934_v27 }
 0x293   : > { %v1333_v1 = vsel %vm1250_vm13, %v1332_v5, %v1331_v18  ;;  %v1171_v51 = vsel %vm1165_vm10, %v1168_v29, %v1170_v6  ;;  %v1190_v11 = vadd.s32 1, %v3045_v40  ;;  %v1337_v2 = vsel %vm3053_vm14, 0, %v1335_v4 }
 0x294   : > { %vm1784_vm15 = vcmp.lt.s32.totalorder %v1783_v15, 0  ;;  %v1336_v41 = vsel %vm3053_vm14, %v2809_v30, %v1333_v1  ;;  %v1187_v0 = vmul.u32 %v1180_v50, %v1171_v51  ;;  %vm1189_vm1 = vc.u32 %v3049_v42, %v3044_v58 }
 0x295   : > { %v1554_v34 = vsel %vm1784_vm15, 0, %v1783_v15  ;;  %2220 = vcosq.f32 %v1336_v41  ;;  %v1191_v27 = vsel %vm1189_vm1, %v1190_v11, %v3045_v40  ;;  %v1341_v24 = vadd.s32 3, %v1337_v2 }
 0x296   : > { %2222 = vsinq.f32 %v1336_v41  ;;  %v1559_v25 = vsub.s32 4294967266, %v1554_v34  ;;  %v1192_v44 = vadd.s32 %v1191_v27, %v1187_v0  ;;  %v1555_v12 = vsub.s32 32, %v1554_v34 }
 0x297   : > { %v1342_v33 = vand.u32 3, %v1341_v24  ;;  %v1539_v17 = vadd.s32 %v2952_v46, %v2958_v10  ;;  %v1556_v60 = vshll.u32 %v3012_v13, %v1554_v34  ;;  %vm1340_vm4 = vweird.f32 %v2809_v30 }
 0x298   : > { %v1560_v43 = vadd.s32 127, %v1559_v25  ;;  %v1193_v63 = vadd.s32 536870912, %v1192_v44  ;;  %v1188_v13 = vadd.s32 %v3044_v58, %v3049_v42  ;;  %vm1485_vm6 = vcmp.lt.s32.totalorder %v2826_v19, 0 }
 0x299   : > { %v1557_v23 = vshrl.u32 %v1539_v17, %v1555_v12  ;;  %vm1347_vm2 = vcmp.eq.s32.totalorder %v1342_v33, 2  ;;  %vm1343_vm3 = vcmp.lt.s32.totalorder %v1342_v33, 2  ;;  %vm1344_vm0 = vcmp.eq.s32.totalorder %v1342_v33, 0 }
 0x29a   : > { %v1194_v56 = vshrl.u32 %v1193_v63, 30  ;;  %v1561_v61 = vshll.u32 %v1560_v43, 23  ;;  %vm3081_vm7 = vcmp.le.f32.partialorder %v1483_v3, 0.7853982  ;;  %v1569_v2 = vsub.s32 4, %v3002_v54 }
 0x29b   : > { %v1558_v46 = vor.u32 %v1557_v23, %v1556_v60  ;;  %vm1134_vm8 = vcmp.lt.s32.totalorder %v2804_v47, 0  ;;  %vm1133_vm9 = vcmp.le.f32.partialorder %v1132_v35, 0.7853982  ;;  %vm1224_vm15 = vweird.f32 %v2804_v47 }
 0x29c   : > { %v1195_v31 = vshll.u32 %v1194_v56, 30  ;;  %v1562_v21 = vor.u32 4788187, %v1561_v61  ;;  %v1218_v11 = vsub.s32 4, %v1194_v56  ;;  %v1570_v24 = vsel %vm1485_vm6, %v1569_v2, %v3002_v54 }
 0x29d   : > { %v1565_v50 = vcvt.s32.f32 %v1558_v46  ;;  %v1572_v43 = vsel %vm3081_vm7, 0, %v1570_v24 }
 0x29e   : > { %v1196_v36 = vsub.s32 %v1192_v44, %v1195_v31  ;;  %v1563_v57 = vand.u32 2147483647, %v1562_v21  ;;  %v1219_v0 = vsel %vm1134_vm8, %v1218_v11, %v1194_v56  ;;  %v1576_v12 = vadd.s32 3, %v1572_v43 }
 0x29f   : > { %v2221_v22 = vpop.eup %2220  ;;  %v1221_v44 = vsel %vm1133_vm9, 0, %v1219_v0 }
 0x2a0   : > { %v2223_v48 = vpop.eup %2222  ;;  %v1348_v49 = vxor.u32 2147483648, %v2221_v22  ;;  %v1198_v38 = vsub.s32 0, %v1196_v36  ;;  %v1566_v6 = vmul.f32 %v1565_v50, %v1563_v57  ;;  %v1225_v63 = vadd.s32 3, %v1221_v44 }
 0x2a1   : > { %v1345_v8 = vxor.u32 2147483648, %v2223_v48  ;;  %v1577_v35 = vand.u32 3, %v1576_v12 }
 0x2a2   : > { %v1349_v16 = vsel %vm1347_vm2, %v1348_v49, %v2223_v48  ;;  %v1770_v18 = vmin.u32 %v1198_v38, %v1196_v36  ;;  %v1567_v32 = vxor.u32 2147483648, %v1566_v6  ;;  %v1226_v17 = vand.u32 3, %v1225_v63 }
 0x2a3   : > { %v1346_v29 = vsel %vm1344_vm0, %v2221_v22, %v1345_v8  ;;  %vm1579_vm12 = vcmp.eq.s32.totalorder %v1577_v35, 0  ;;  %vm1582_vm13 = vcmp.eq.s32.totalorder %v1577_v35, 2  ;;  %vm1578_vm1 = vcmp.lt.s32.totalorder %v1577_v35, 2 }
 0x2a4   : > { %v1350_v26 = vsel %vm1343_vm3, %v1346_v29, %v1349_v16  ;;  %v1200_v20 = vclz %v1770_v18  ;;  %v1568_v62 = vsel %vm1485_vm6, %v1567_v32, %v1566_v6  ;;  %vm1231_vm10 = vcmp.eq.s32.totalorder %v1226_v17, 2 }
 0x2a5   : > { %v1351_v10 = vsel %vm1340_vm4, nan, %v1350_v26  ;;  %v1571_v42 = vsel %vm3081_vm7, %v2826_v19, %v1568_v62  ;;  %vm1228_vm11 = vcmp.eq.s32.totalorder %v1226_v17, 0  ;;  %vm1227_vm14 = vcmp.lt.s32.totalorder %v1226_v17, 2 }
 0x2a6   : > { %1353 = vrot.lane.b32.xlu0 %v1351_v10, %s2282_s19  ;;  %v1771_v52 = vadd.s32 4294967294, %v1200_v20  ;;  %2224 = vcosq.f32 %v1571_v42  ;;  %vm1575_vm2 = vweird.f32 %v2826_v19  ;;  %v1593_v10 = vld [vmem:[%s264_s7] sm:$0xff]  ;;  %vm1639_vm3 = vcmask 261120  }
 0x2a7   : > { %2226 = vsinq.f32 %v1571_v42  ;;  %vm1652_vm0 = vcmask 7168  }
 0x2a8   : > { %vm1772_vm5 = vcmp.lt.s32.totalorder %v1771_v52, 0 }
 0x2a9   : > { %v1203_v39 = vsel %vm1772_vm5, 0, %v1771_v52 }
 0x2aa   : > { %v1204_v55 = vsub.s32 32, %v1203_v39  ;;  %v1208_v5 = vsub.s32 4294967266, %v1203_v39  ;;  %v1205_v40 = vshll.u32 %v1196_v36, %v1203_v39 }
 0x2ac   : > { %v1206_v30 = vshrl.u32 %v1188_v13, %v1204_v55  ;;  %v1209_v15 = vadd.s32 127, %v1208_v5 }
 0x2ae   : > { %v1207_v45 = vor.u32 %v1206_v30, %v1205_v40  ;;  %v1210_v1 = vshll.u32 %v1209_v15, 23  ;;  %v1594_v30 = vmul.f32 0.7, %v2995_v7 }
 0x2b0   : > { %v1211_v4 = vor.u32 4788187, %v1210_v1  ;;  %v1214_v51 = vcvt.s32.f32 %v1207_v45  ;;  %v2225_v33 = vpop.eup %2224 }
 0x2b1   : > { %v2227_v22 = vpop.eup %2226  ;;  %v1583_v31 = vxor.u32 2147483648, %v2225_v33 }
 0x2b2   : > { %v1212_v41 = vand.u32 2147483647, %v1211_v4  ;;  %v1580_v56 = vxor.u32 2147483648, %v2227_v22 }
 0x2b3   : > { %v1584_v21 = vsel %vm1582_vm13, %v1583_v31, %v2227_v22 }
 0x2b4   : > { %v1215_v34 = vmul.f32 %v1214_v51, %v1212_v41  ;;  %v1581_v60 = vsel %vm1579_vm12, %v2225_v33, %v1580_v56 }
 0x2b6   : > { %v1216_v25 = vxor.u32 2147483648, %v1215_v34 }
 0x2b8   : > { %v1217_v3 = vsel %vm1134_vm8, %v1216_v25, %v1215_v34 }
 0x2b9   : > { %v1220_v27 = vsel %vm1133_vm9, %v2804_v47, %v1217_v3  ;;  %v1595_v47 = vmul.f32 0.3, %v1593_v10 }
 0x2ba   : > { %2228 = vcosq.f32 %v1220_v27 }
 0x2bb   : > { %2230 = vsinq.f32 %v1220_v27  ;;  %v1596_v62 = vadd.f32 %v1595_v47, %v1594_v30 }
 0x2c4   : > { %v2229_v61 = vpop.eup %2228 }
 0x2c5   : > { %v2231_v49 = vpop.eup %2230  ;;  %v1232_v23 = vxor.u32 2147483648, %v2229_v61 }
 0x2c6   : > { %v1229_v8 = vxor.u32 2147483648, %v2231_v49 }
 0x2c7   : > { %v1233_v36 = vsel %vm1231_vm10, %v1232_v23, %v2231_v49 }
 0x2c8   : > { %v1114_v48 = vpop.permute.xlu1 %1113  ;;  %v1230_v16 = vsel %vm1228_vm11, %v2229_v61, %v1229_v8 }
 0x2c9   : > { %v1116_v54 = vmul.f32 %v1114_v48, %v2577_v14  ;;  %v1234_v29 = vsel %vm1227_vm14, %v1230_v16, %v1233_v36  ;;  %v1585_v14 = vsel %vm1578_vm1, %v1581_v60, %v1584_v21 }
 0x2ca   : > { %v1235_v38 = vsel %vm1224_vm15, nan, %v1234_v29  ;;  %v1586_v26 = vsel %vm1575_vm2, nan, %v1585_v14 }
 0x2cb   : > { %1118 = vrot.lane.b32.xlu1 %v1116_v54, %s2282_s19  ;;  %1237 = vrot.lane.b32.xlu0 %v1235_v38, %s2282_s19 }
 0x2cf   : > { %1588 = vrot.lane.b32.xlu0 %v1586_v26, %s2282_s19 }
 0x2f0   : > { %v995_v57 = vpop.permute.xlu1 %994 }
 0x2f1   : > { %v997_v19 = vmul.f32 %v995_v57, %v2575_v9 }
 0x300   : > { %v1469_v46 = vpop.permute.xlu0 %1468 }
 0x301   : > { %v1471_v18 = vmul.f32 %v1469_v46, %v2653_v59 }
 0x303   : > { %1473 = vrot.lane.b32.xlu1 %v1471_v18, %s2282_s19 }
 0x307   : > { %1598 = vrot.lane.b32.xlu1 %v1595_v47, %s2282_s19 }
 0x318   : > { %v1354_v20 = vpop.permute.xlu0 %1353 }
 0x319   : > { %v1356_v59 = vmul.f32 %v1354_v20, %v2624_v37 }
 0x33d   : > { %v1119_v50 = vpop.permute.xlu1 %1118  ;;  %v1238_v6 = vpop.permute.xlu0 %1237 }
 0x33e   : > { %v1121_v52 = vadd.f32 %v1119_v50, %v997_v19  ;;  %v1240_v39 = vmul.f32 %v1238_v6, %v2581_v28 }
 0x340   : > { %v1241_v13 = vadd.f32 %v1240_v39, %v1121_v52 }
 0x341   : > { %v1589_v55 = vpop.permute.xlu0 %1588 }
 0x342   : > { %1630 = vrot.lane.b32.xlu1 %v1241_v13, %s2289_s8  ;;  %v1591_v32 = vmul.f32 %v1589_v55, %v2657_v53 }
 0x375   : > { %v1474_v5 = vpop.permute.xlu1 %1473 }
 0x376   : > { %v1476_v40 = vadd.f32 %v1474_v5, %v1356_v59 }
 0x378   : > { %v1592_v15 = vadd.f32 %v1591_v32, %v1476_v40 }
 0x379   : > { %v1599_v45 = vpop.permute.xlu1 %1598 }
 0x37a   : > { %v1601_v1 = vadd.f32 %v1599_v45, %v1594_v30  ;;  %1620 = vrot.lane.b32.xlu0 %v1592_v15, %s2289_s8 }
 0x37c   : > { %1634 = vrot.lane.b32.xlu1 %v1601_v1, %s2289_s8 }
 0x37e   : > { %1625 = vrot.lane.b32.xlu0 %v1596_v62, %s2290_s9 }
 0x380   : > { %1609 = vrot.lane.b32.xlu1 %v2575_v9, %s2289_s8 }
 0x382   : > { %1603 = vrot.lane.b32.xlu0 %v2624_v37, %s2289_s8 }
 0x386   : > { %1614 = vrot.lane.b32.xlu0 %v1601_v1, %s2282_s19 }
 0x3b4   : > { %v1631_v28 = vpop.permute.xlu1 %1630 }
 0x3b5   : > { %v1633_v41 = vmul.f32 %v1631_v28, %v1592_v15 }
 0x3ec   : > { %v1621_v4 = vpop.permute.xlu0 %1620 }
 0x3ed   : > { %v1623_v51 = vmul.f32 %v1621_v4, %v1241_v13 }
 0x3ee   : > { %v1635_v53 = vpop.permute.xlu1 %1634 }
 0x3ef   : > { %v1637_v58 = vmul.f32 %v1635_v53, %v1633_v41 }
 0x3f0   : > { %v1626_v7 = vpop.permute.xlu0 %1625 }
 0x3f1   : > { %v1628_v42 = vmul.f32 %v1626_v7, %v1623_v51 }
 0x3f2   : > { %v1610_v11 = vpop.permute.xlu1 %1609 }
 0x3f3   : > { %v1638_v34 = vadd.f32 %v1637_v58, %v1628_v42  ;;  %v1612_v3 = vmul.f32 %v1610_v11, %v2624_v37 }
 0x3f4   : > { %v1604_v2 = vpop.permute.xlu0 %1603 }
 0x3f5   : > { %v1606_v25 = vmul.f32 %v1604_v2, %v2575_v9  ;;  %1644 = vrot.lane.b32.xlu1 %v1638_v34, %s2282_s19 }
 0x3f7   : > { %v1607_v27 = vmul.f32 %v1606_v25, %v1596_v62 }
 0x3f8   : > { %v1615_v0 = vpop.permute.xlu0 %1614 }
 0x3f9   : > { %v1617_v24 = vmul.f32 %v1615_v0, %v1612_v3 }
 0x3fb   : > { %v1618_v44 = vadd.f32 %v1617_v24, %v1607_v27 }
 0x3fd   : > { %v1640_v43 = vsel %vm1639_vm3, %v1618_v44, 0.0 }
 0x3fe   : > { %1641 = vadd.xlane.f32.xlu0 %v1640_v43 }
 0x467   : > { %v1645_v63 = vpop.permute.xlu1 %1644 }
 0x468   : > { %v1647_v12 = vsel %vm1639_vm3, %v1645_v63, 0.0 }
 0x469   : > { %1648 = vadd.xlane.f32.xlu1 %v1647_v12 }
 0x48b   : > { %v1642_v33 = vpop.xlane.xlu0 %1641 }
 0x4f6   : > { %v1649_v22 = vpop.xlane.xlu1 %1648 }
 0x4f7   : > { %v1650_v17 = vadd.f32 %v1649_v22, %v1642_v33 }
 0x4f9   : > { %v1651_v9 = vmul.f32 0.5, %v1650_v17 }
 0x4fb   : > { %1653 = vst.msk [vmem:[%s268_s13] sm:$0xff] %vm1652_vm0, %v1651_v9 }
 0x4fc PF: > { %s16_s18 = sadd.s32 1, %s2270_s18  }
 0x4fd   : > { %p13_p3 = scmp.ge.s32.totalorder %s16_s18, 4  }
 0x4ff   :  { %15 = sbr.rel (!%p13_p3) target bundleno = 1 (0x1), region = 81 }
 0x506   :  { %1673 = vsyncpa [#allocation3], 1 }
 0x507   :  { %1675 = vsyncpa [#allocation3 + $0x1], 1 }

</bundles_post_ra>
